<compile_context>
chip_gen: v7x
topology: tpu7x:2x2x1
jax: 0.10.0
libtpu: 0.0.40
codegen_flags: <defaults>
</compile_context>

<pallas_src>
import functools

import jax
import jax.numpy as jnp
from jax import lax
from jax.experimental import pallas as pl
from jax.experimental.pallas import tpu as pltpu  # noqa: F401  (no scratch needed at these shapes)


# ----------------------------------------------------------------------------
# Pallas kernel
# ----------------------------------------------------------------------------
def lstm2_tag_kernel(x_ref,      # (T*B, E)  time-major flattened input
                     wih0_ref,   # (E, 4H)   layer-0 input weights, g-cols pre-scaled x2
                     b0_ref,     # (1, 4H)   b_ih0 + b_hh0,         g-cols pre-scaled x2
                     wbig_ref,   # (2H, 8H)  [[Wih1;Whh1] | [Whh0;0]], g-cols pre-scaled x2
                     b1_ref,     # (1, 4H)   b_ih1 + b_hh1,         g-cols pre-scaled x2
                     wout_ref,   # (H, L)
                     bout_ref,   # (1, L)
                     out_ref,    # (T*B, L)
                     *, B):
    TB = x_ref.shape[0]
    H = wout_ref.shape[0]
    G = 4 * H
    L = out_ref.shape[1]
    T = TB // B

    # ---- hoisted layer-0 input projection: one big MXU matmul, bias folded in.
    # Kept as a value (2 vregs at these shapes) instead of a VMEM scratch slab.
    pg = (jnp.dot(x_ref[...], wih0_ref[...], preferred_element_type=jnp.float32)
          + jnp.broadcast_to(b0_ref[...], (TB, G)))

    # Loop-invariant operands hoisted (JAX does not CSE broadcast_in_dim/iota).
    wbig = wbig_ref[...]
    b1 = jnp.broadcast_to(b1_ref[...], (B, G))
    lane = lax.broadcasted_iota(jnp.int32, (B, G), 1)
    g_mask = (lane >= 2 * H) & (lane < 3 * H)        # "g" gate block

    def activate(gates):
        # One full-width EUP sigmoid; tanh on the (pre-scaled-by-2) g block is
        # recovered as 2*sigmoid(2z) - 1 with a cheap VPU mul-add + select.
        a = jax.nn.sigmoid(gates)
        return jnp.where(g_mask, 2.0 * a - 1.0, a)

    def cell_update(a, c):
        # gate order i, f, g, o (PyTorch)
        c_new = a[:, H:2 * H] * c + a[:, 0:H] * a[:, 2 * H:3 * H]
        h_new = a[:, 3 * H:4 * H] * jnp.tanh(c_new)
        return h_new, c_new

    z = jnp.zeros((B, H), jnp.float32)               # PyTorch default h0 = c0 = 0
    h0, c0, h1, c1 = z, z, z, z
    rec0 = jnp.zeros((B, G), jnp.float32)            # h0(-1)=0 -> no recurrent term at t=0
    h1_steps = []

    # Static Python loop: all slices below are static; LSTM state lives in vregs.
    for t in range(T):
        # layer 0: no matmul on the critical path (its recurrent part was
        # produced by the fused matmul of step t-1).
        a0 = activate(pg[t * B:(t + 1) * B, :] + rec0)
        h0, c0 = cell_update(a0, c0)

        # One fused (B, 2H) @ (2H, 8H) matmul: layer-1 gates of step t AND the
        # layer-0 recurrent contribution for step t+1.
        big = jnp.dot(jnp.concatenate([h0, h1], axis=1), wbig,
                      preferred_element_type=jnp.float32)
        rec0 = big[:, G:2 * G]

        a1 = activate(big[:, 0:G] + b1)
        h1, c1 = cell_update(a1, c1)
        h1_steps.append(h1)

    # ---- hoisted output projection: one (T*B, H) @ (H, L) matmul + one store.
    h1seq = jnp.concatenate(h1_steps, axis=0)        # (T*B, H)
    out_ref[...] = (jnp.dot(h1seq, wout_ref[...], preferred_element_type=jnp.float32)
                    + jnp.broadcast_to(bout_ref[...], (TB, L))
                    ).astype(out_ref.dtype)


# ----------------------------------------------------------------------------
# Wrapper: parameter plumbing + pallas_call (single block, no grid at this size)
# ----------------------------------------------------------------------------
def discriminator2_forward(embeds, params):
    """embeds: (B, T, E) batch-first, like the PyTorch module.  Returns (B, T, L)."""
    B, T, E = embeds.shape
    H, L = params["wout_t"].shape

    # Batch-first -> time-major flattened rows (row index = t*B + b).  At scale
    # fold this transpose into the hoisted pregate matmul / per-t indexing.
    x2d = jnp.transpose(embeds, (1, 0, 2)).reshape(T * B, E)

    out2d = pl.pallas_call(
        functools.partial(lstm2_tag_kernel, B=B),
        out_shape=jax.ShapeDtypeStruct((T * B, L), jnp.float32),
    )(x2d,
      params["k_wih0"], params["k_b0"],
      params["k_wbig"], params["k_b1"],
      params["wout_t"], params["bout"])

    return jnp.transpose(out2d.reshape(T, B, L), (1, 0, 2))


# ----------------------------------------------------------------------------
# Deterministic parameter init (same shapes as nn.LSTM(E, H, num_layers=2) +
# nn.Linear(H, L)); also builds kernel-ready fused / pre-scaled weights.
# ----------------------------------------------------------------------------
def init_params(key, E, H, L):
    ks = jax.random.split(key, 10)
    s = 0.1

    def rnd(k, shape):
        return (s * jax.random.normal(k, shape)).astype(jnp.float32)

    # PyTorch stores weight_ih_l0 as (4H, E) etc.; gate order i, f, g, o.
    wih0 = rnd(ks[0], (4 * H, E))
    whh0 = rnd(ks[1], (4 * H, H))
    bih0 = rnd(ks[2], (4 * H,))
    bhh0 = rnd(ks[3], (4 * H,))
    wih1 = rnd(ks[4], (4 * H, H))
    whh1 = rnd(ks[5], (4 * H, H))
    bih1 = rnd(ks[6], (4 * H,))
    bhh1 = rnd(ks[7], (4 * H,))
    wout = rnd(ks[8], (L, H))
    bout = rnd(ks[9], (L,))

    wih0_t, whh0_t = wih0.T, whh0.T
    wih1_t, whh1_t = wih1.T, whh1.T
    b0 = (bih0 + bhh0)[None, :]
    b1 = (bih1 + bhh1)[None, :]

    # --- kernel-ready weights: "g" gate columns pre-scaled by 2 so the kernel
    #     can use a single sigmoid pass (tanh(z) = 2*sigmoid(2z) - 1).
    def scale_g(w):
        return w.at[..., 2 * H:3 * H].multiply(2.0)

    wih0_k = scale_g(wih0_t)                                     # (E, 4H)
    whh0_k = scale_g(whh0_t)                                     # (H, 4H)
    b0_k = scale_g(b0)                                           # (1, 4H)
    w1cat_k = scale_g(jnp.concatenate([wih1_t, whh1_t], 0))      # (2H, 4H)
    b1_k = scale_g(b1)                                           # (1, 4H)

    # Fused per-step weight: [h0(t), h1(t-1)] @ W_big -> [g1(t) | rec0(t+1)]
    wbig = jnp.concatenate(
        [w1cat_k,
         jnp.concatenate([whh0_k, jnp.zeros((H, 4 * H), jnp.float32)], axis=0)],
        axis=1)                                                  # (2H, 8H)

    return {
        # raw weights (reference path)
        "wih0_t": wih0_t, "whh0_t": whh0_t, "b0": b0,
        "wih1_t": wih1_t, "whh1_t": whh1_t, "b1": b1,
        "wout_t": wout.T, "bout": bout[None, :],
        # kernel-ready (pre-scaled / fused)
        "k_wih0": wih0_k, "k_b0": b0_k, "k_wbig": wbig, "k_b1": b1_k,
    }


# ----------------------------------------------------------------------------
# Pure-JAX reference (lax.scan, unfused / unscaled weights) for verification.
# ----------------------------------------------------------------------------
def reference_forward(embeds, params):
    B, T, E = embeds.shape
    H = params["whh0_t"].shape[0]

    def cell(x, h, c, wih_t, whh_t, b):
        gates = x @ wih_t + h @ whh_t + b
        i = jax.nn.sigmoid(gates[:, 0 * H:1 * H])
        f = jax.nn.sigmoid(gates[:, 1 * H:2 * H])
        g = jnp.tanh(gates[:, 2 * H:3 * H])
        o = jax.nn.sigmoid(gates[:, 3 * H:4 * H])
        c_new = f * c + i * g
        return o * jnp.tanh(c_new), c_new

    def step(carry, x_t):
        h0, c0, h1, c1 = carry
        h0, c0 = cell(x_t, h0, c0, params["wih0_t"], params["whh0_t"], params["b0"])
        h1, c1 = cell(h0, h1, c1, params["wih1_t"], params["whh1_t"], params["b1"])
        y = h1 @ params["wout_t"] + params["bout"]
        return (h0, c0, h1, c1), y

    z = jnp.zeros((B, H), jnp.float32)
    _, ys = lax.scan(step, (z, z, z, z), jnp.transpose(embeds, (1, 0, 2)))
    return jnp.transpose(ys, (1, 0, 2))


if __name__ == "__main__":
    B, T, E, H, L = 2, 8, 16, 32, 8   # batch, seq, embedding_dim, hidden_dim, label_size

    key = jax.random.PRNGKey(0)
    k_x, k_p = jax.random.split(key)
    embeds = jax.random.normal(k_x, (B, T, E), dtype=jnp.float32)
    params = init_params(k_p, E, H, L)

    out = jax.block_until_ready(discriminator2_forward(embeds, params))
    ref = jax.block_until_ready(reference_forward(embeds, params))

    assert out.shape == (B, T, L), out.shape
    assert jnp.allclose(out, ref, atol=1e-4, rtol=1e-4), float(jnp.max(jnp.abs(out - ref)))

    print("KERNEL_OK")
</pallas_src>

<mosaic_0001>
module attributes {stable_mosaic.version = 11 : i64} {
  func.func @lstm2_tag_kernel(%arg0: memref<16x16xf32, #tpu.memory_space<vmem>>, %arg1: memref<16x128xf32, #tpu.memory_space<vmem>>, %arg2: memref<1x128xf32, #tpu.memory_space<vmem>>, %arg3: memref<64x256xf32, #tpu.memory_space<vmem>>, %arg4: memref<1x128xf32, #tpu.memory_space<vmem>>, %arg5: memref<32x8xf32, #tpu.memory_space<vmem>>, %arg6: memref<1x8xf32, #tpu.memory_space<vmem>>, %arg7: memref<16x8xf32, #tpu.memory_space<vmem>>) attributes {dimension_semantics = [], scalar_prefetch = 0 : i64, scratch_operands = 0 : i64, tpu.core_type = #tpu.core_type<tc>} {
    %c0 = arith.constant 0 : index
    %c0_0 = arith.constant 0 : index
    %0 = vector.load %arg0[%c0, %c0_0] : memref<16x16xf32, #tpu.memory_space<vmem>>, vector<16x16xf32>
    %c0_1 = arith.constant 0 : index
    %c0_2 = arith.constant 0 : index
    %1 = vector.load %arg1[%c0_1, %c0_2] : memref<16x128xf32, #tpu.memory_space<vmem>>, vector<16x128xf32>
    %cst = arith.constant dense<0.000000e+00> : vector<16x128xf32>
    %2 = tpu.matmul %0, %1, %cst {dimension_numbers = #tpu.dot_dimension_numbers<[1], [0], [0], [1], [0, 0, 1, 1], [], []>} : vector<16x16xf32>, vector<16x128xf32>, vector<16x128xf32> -> vector<16x128xf32>
    %c0_3 = arith.constant 0 : index
    %c0_4 = arith.constant 0 : index
    %3 = vector.load %arg2[%c0_3, %c0_4] : memref<1x128xf32, #tpu.memory_space<vmem>>, vector<1x128xf32>
    %4 = vector.shape_cast %3 : vector<1x128xf32> to vector<1x128xf32>
    %5 = vector.broadcast %4 : vector<1x128xf32> to vector<16x128xf32>
    %6 = arith.addf %2, %5 : vector<16x128xf32>
    %c0_5 = arith.constant 0 : index
    %c0_6 = arith.constant 0 : index
    %7 = vector.load %arg3[%c0_5, %c0_6] : memref<64x256xf32, #tpu.memory_space<vmem>>, vector<64x256xf32>
    %c0_7 = arith.constant 0 : index
    %c0_8 = arith.constant 0 : index
    %8 = vector.load %arg4[%c0_7, %c0_8] : memref<1x128xf32, #tpu.memory_space<vmem>>, vector<1x128xf32>
    %9 = vector.shape_cast %8 : vector<1x128xf32> to vector<1x128xf32>
    %10 = vector.broadcast %9 : vector<1x128xf32> to vector<2x128xf32>
    %11 = tpu.iota {dimensions = array<i32: 1>} : vector<2x128xi32>
    %c64_i32 = arith.constant 64 : i32
    %12 = vector.broadcast %c64_i32 : i32 to vector<2x128xi32>
    %13 = arith.cmpi sge, %11, %12 : vector<2x128xi32>
    %c96_i32 = arith.constant 96 : i32
    %14 = vector.broadcast %c96_i32 : i32 to vector<2x128xi32>
    %15 = arith.cmpi slt, %11, %14 : vector<2x128xi32>
    %16 = arith.andi %13, %15 : vector<2x128xi1>
    %cst_9 = arith.constant 0.000000e+00 : f32
    %17 = vector.broadcast %cst_9 : f32 to vector<2x32xf32>
    %cst_10 = arith.constant 0.000000e+00 : f32
    %18 = vector.broadcast %cst_10 : f32 to vector<2x128xf32>
    %19 = vector.extract_strided_slice %6 {offsets = [0, 0], sizes = [2, 128], strides = [1, 1]} : vector<16x128xf32> to vector<2x128xf32>
    %20 = arith.addf %19, %18 : vector<2x128xf32>
    %21 = arith.negf %20 : vector<2x128xf32>
    %22 = math.exp %21 : vector<2x128xf32>
    %cst_11 = arith.constant 1.000000e+00 : f32
    %23 = vector.broadcast %cst_11 : f32 to vector<2x128xf32>
    %24 = arith.addf %23, %22 : vector<2x128xf32>
    %25 = arith.divf %23, %24 : vector<2x128xf32>
    %cst_12 = arith.constant 2.000000e+00 : f32
    %26 = vector.broadcast %cst_12 : f32 to vector<2x128xf32>
    %27 = arith.mulf %26, %25 : vector<2x128xf32>
    %cst_13 = arith.constant 1.000000e+00 : f32
    %28 = vector.broadcast %cst_13 : f32 to vector<2x128xf32>
    %29 = arith.subf %27, %28 : vector<2x128xf32>
    %30 = arith.select %16, %29, %25 : vector<2x128xi1>, vector<2x128xf32>
    %31 = vector.extract_strided_slice %30 {offsets = [0, 32], sizes = [2, 32], strides = [1, 1]} : vector<2x128xf32> to vector<2x32xf32>
    %32 = arith.mulf %31, %17 : vector<2x32xf32>
    %33 = vector.extract_strided_slice %30 {offsets = [0, 0], sizes = [2, 32], strides = [1, 1]} : vector<2x128xf32> to vector<2x32xf32>
    %34 = vector.extract_strided_slice %30 {offsets = [0, 64], sizes = [2, 32], strides = [1, 1]} : vector<2x128xf32> to vector<2x32xf32>
    %35 = arith.mulf %33, %34 : vector<2x32xf32>
    %36 = arith.addf %32, %35 : vector<2x32xf32>
    %37 = vector.extract_strided_slice %30 {offsets = [0, 96], sizes = [2, 32], strides = [1, 1]} : vector<2x128xf32> to vector<2x32xf32>
    %38 = math.tanh %36 : vector<2x32xf32>
    %39 = arith.mulf %37, %38 : vector<2x32xf32>
    %40 = tpu.concatenate %39, %17 in 1 : vector<2x32xf32>, vector<2x32xf32> -> vector<2x64xf32>
    %cst_14 = arith.constant dense<0.000000e+00> : vector<2x256xf32>
    %41 = tpu.matmul %40, %7, %cst_14 {dimension_numbers = #tpu.dot_dimension_numbers<[1], [0], [0], [1], [0, 0, 1, 1], [], []>} : vector<2x64xf32>, vector<64x256xf32>, vector<2x256xf32> -> vector<2x256xf32>
    %42 = vector.extract_strided_slice %41 {offsets = [0, 128], sizes = [2, 128], strides = [1, 1]} : vector<2x256xf32> to vector<2x128xf32>
    %43 = vector.extract_strided_slice %41 {offsets = [0, 0], sizes = [2, 128], strides = [1, 1]} : vector<2x256xf32> to vector<2x128xf32>
    %44 = arith.addf %43, %10 : vector<2x128xf32>
    %45 = arith.negf %44 : vector<2x128xf32>
    %46 = math.exp %45 : vector<2x128xf32>
    %cst_15 = arith.constant 1.000000e+00 : f32
    %47 = vector.broadcast %cst_15 : f32 to vector<2x128xf32>
    %48 = arith.addf %47, %46 : vector<2x128xf32>
    %49 = arith.divf %47, %48 : vector<2x128xf32>
    %cst_16 = arith.constant 2.000000e+00 : f32
    %50 = vector.broadcast %cst_16 : f32 to vector<2x128xf32>
    %51 = arith.mulf %50, %49 : vector<2x128xf32>
    %cst_17 = arith.constant 1.000000e+00 : f32
    %52 = vector.broadcast %cst_17 : f32 to vector<2x128xf32>
    %53 = arith.subf %51, %52 : vector<2x128xf32>
    %54 = arith.select %16, %53, %49 : vector<2x128xi1>, vector<2x128xf32>
    %55 = vector.extract_strided_slice %54 {offsets = [0, 32], sizes = [2, 32], strides = [1, 1]} : vector<2x128xf32> to vector<2x32xf32>
    %56 = arith.mulf %55, %17 : vector<2x32xf32>
    %57 = vector.extract_strided_slice %54 {offsets = [0, 0], sizes = [2, 32], strides = [1, 1]} : vector<2x128xf32> to vector<2x32xf32>
    %58 = vector.extract_strided_slice %54 {offsets = [0, 64], sizes = [2, 32], strides = [1, 1]} : vector<2x128xf32> to vector<2x32xf32>
    %59 = arith.mulf %57, %58 : vector<2x32xf32>
    %60 = arith.addf %56, %59 : vector<2x32xf32>
    %61 = vector.extract_strided_slice %54 {offsets = [0, 96], sizes = [2, 32], strides = [1, 1]} : vector<2x128xf32> to vector<2x32xf32>
    %62 = math.tanh %60 : vector<2x32xf32>
    %63 = arith.mulf %61, %62 : vector<2x32xf32>
    %64 = vector.extract_strided_slice %6 {offsets = [2, 0], sizes = [2, 128], strides = [1, 1]} : vector<16x128xf32> to vector<2x128xf32>
    %65 = arith.addf %64, %42 : vector<2x128xf32>
    %66 = arith.negf %65 : vector<2x128xf32>
    %67 = math.exp %66 : vector<2x128xf32>
    %cst_18 = arith.constant 1.000000e+00 : f32
    %68 = vector.broadcast %cst_18 : f32 to vector<2x128xf32>
    %69 = arith.addf %68, %67 : vector<2x128xf32>
    %70 = arith.divf %68, %69 : vector<2x128xf32>
    %cst_19 = arith.constant 2.000000e+00 : f32
    %71 = vector.broadcast %cst_19 : f32 to vector<2x128xf32>
    %72 = arith.mulf %71, %70 : vector<2x128xf32>
    %cst_20 = arith.constant 1.000000e+00 : f32
    %73 = vector.broadcast %cst_20 : f32 to vector<2x128xf32>
    %74 = arith.subf %72, %73 : vector<2x128xf32>
    %75 = arith.select %16, %74, %70 : vector<2x128xi1>, vector<2x128xf32>
    %76 = vector.extract_strided_slice %75 {offsets = [0, 32], sizes = [2, 32], strides = [1, 1]} : vector<2x128xf32> to vector<2x32xf32>
    %77 = arith.mulf %76, %36 : vector<2x32xf32>
    %78 = vector.extract_strided_slice %75 {offsets = [0, 0], sizes = [2, 32], strides = [1, 1]} : vector<2x128xf32> to vector<2x32xf32>
    %79 = vector.extract_strided_slice %75 {offsets = [0, 64], sizes = [2, 32], strides = [1, 1]} : vector<2x128xf32> to vector<2x32xf32>
    %80 = arith.mulf %78, %79 : vector<2x32xf32>
    %81 = arith.addf %77, %80 : vector<2x32xf32>
    %82 = vector.extract_strided_slice %75 {offsets = [0, 96], sizes = [2, 32], strides = [1, 1]} : vector<2x128xf32> to vector<2x32xf32>
    %83 = math.tanh %81 : vector<2x32xf32>
    %84 = arith.mulf %82, %83 : vector<2x32xf32>
    %85 = tpu.concatenate %84, %63 in 1 : vector<2x32xf32>, vector<2x32xf32> -> vector<2x64xf32>
    %cst_21 = arith.constant dense<0.000000e+00> : vector<2x256xf32>
    %86 = tpu.matmul %85, %7, %cst_21 {dimension_numbers = #tpu.dot_dimension_numbers<[1], [0], [0], [1], [0, 0, 1, 1], [], []>} : vector<2x64xf32>, vector<64x256xf32>, vector<2x256xf32> -> vector<2x256xf32>
    %87 = vector.extract_strided_slice %86 {offsets = [0, 128], sizes = [2, 128], strides = [1, 1]} : vector<2x256xf32> to vector<2x128xf32>
    %88 = vector.extract_strided_slice %86 {offsets = [0, 0], sizes = [2, 128], strides = [1, 1]} : vector<2x256xf32> to vector<2x128xf32>
    %89 = arith.addf %88, %10 : vector<2x128xf32>
    %90 = arith.negf %89 : vector<2x128xf32>
    %91 = math.exp %90 : vector<2x128xf32>
    %cst_22 = arith.constant 1.000000e+00 : f32
    %92 = vector.broadcast %cst_22 : f32 to vector<2x128xf32>
    %93 = arith.addf %92, %91 : vector<2x128xf32>
    %94 = arith.divf %92, %93 : vector<2x128xf32>
    %cst_23 = arith.constant 2.000000e+00 : f32
    %95 = vector.broadcast %cst_23 : f32 to vector<2x128xf32>
    %96 = arith.mulf %95, %94 : vector<2x128xf32>
    %cst_24 = arith.constant 1.000000e+00 : f32
    %97 = vector.broadcast %cst_24 : f32 to vector<2x128xf32>
    %98 = arith.subf %96, %97 : vector<2x128xf32>
    %99 = arith.select %16, %98, %94 : vector<2x128xi1>, vector<2x128xf32>
    %100 = vector.extract_strided_slice %99 {offsets = [0, 32], sizes = [2, 32], strides = [1, 1]} : vector<2x128xf32> to vector<2x32xf32>
    %101 = arith.mulf %100, %60 : vector<2x32xf32>
    %102 = vector.extract_strided_slice %99 {offsets = [0, 0], sizes = [2, 32], strides = [1, 1]} : vector<2x128xf32> to vector<2x32xf32>
    %103 = vector.extract_strided_slice %99 {offsets = [0, 64], sizes = [2, 32], strides = [1, 1]} : vector<2x128xf32> to vector<2x32xf32>
    %104 = arith.mulf %102, %103 : vector<2x32xf32>
    %105 = arith.addf %101, %104 : vector<2x32xf32>
    %106 = vector.extract_strided_slice %99 {offsets = [0, 96], sizes = [2, 32], strides = [1, 1]} : vector<2x128xf32> to vector<2x32xf32>
    %107 = math.tanh %105 : vector<2x32xf32>
    %108 = arith.mulf %106, %107 : vector<2x32xf32>
    %109 = vector.extract_strided_slice %6 {offsets = [4, 0], sizes = [2, 128], strides = [1, 1]} : vector<16x128xf32> to vector<2x128xf32>
    %110 = arith.addf %109, %87 : vector<2x128xf32>
    %111 = arith.negf %110 : vector<2x128xf32>
    %112 = math.exp %111 : vector<2x128xf32>
    %cst_25 = arith.constant 1.000000e+00 : f32
    %113 = vector.broadcast %cst_25 : f32 to vector<2x128xf32>
    %114 = arith.addf %113, %112 : vector<2x128xf32>
    %115 = arith.divf %113, %114 : vector<2x128xf32>
    %cst_26 = arith.constant 2.000000e+00 : f32
    %116 = vector.broadcast %cst_26 : f32 to vector<2x128xf32>
    %117 = arith.mulf %116, %115 : vector<2x128xf32>
    %cst_27 = arith.constant 1.000000e+00 : f32
    %118 = vector.broadcast %cst_27 : f32 to vector<2x128xf32>
    %119 = arith.subf %117, %118 : vector<2x128xf32>
    %120 = arith.select %16, %119, %115 : vector<2x128xi1>, vector<2x128xf32>
    %121 = vector.extract_strided_slice %120 {offsets = [0, 32], sizes = [2, 32], strides = [1, 1]} : vector<2x128xf32> to vector<2x32xf32>
    %122 = arith.mulf %121, %81 : vector<2x32xf32>
    %123 = vector.extract_strided_slice %120 {offsets = [0, 0], sizes = [2, 32], strides = [1, 1]} : vector<2x128xf32> to vector<2x32xf32>
    %124 = vector.extract_strided_slice %120 {offsets = [0, 64], sizes = [2, 32], strides = [1, 1]} : vector<2x128xf32> to vector<2x32xf32>
    %125 = arith.mulf %123, %124 : vector<2x32xf32>
    %126 = arith.addf %122, %125 : vector<2x32xf32>
    %127 = vector.extract_strided_slice %120 {offsets = [0, 96], sizes = [2, 32], strides = [1, 1]} : vector<2x128xf32> to vector<2x32xf32>
    %128 = math.tanh %126 : vector<2x32xf32>
    %129 = arith.mulf %127, %128 : vector<2x32xf32>
    %130 = tpu.concatenate %129, %108 in 1 : vector<2x32xf32>, vector<2x32xf32> -> vector<2x64xf32>
    %cst_28 = arith.constant dense<0.000000e+00> : vector<2x256xf32>
    %131 = tpu.matmul %130, %7, %cst_28 {dimension_numbers = #tpu.dot_dimension_numbers<[1], [0], [0], [1], [0, 0, 1, 1], [], []>} : vector<2x64xf32>, vector<64x256xf32>, vector<2x256xf32> -> vector<2x256xf32>
    %132 = vector.extract_strided_slice %131 {offsets = [0, 128], sizes = [2, 128], strides = [1, 1]} : vector<2x256xf32> to vector<2x128xf32>
    %133 = vector.extract_strided_slice %131 {offsets = [0, 0], sizes = [2, 128], strides = [1, 1]} : vector<2x256xf32> to vector<2x128xf32>
    %134 = arith.addf %133, %10 : vector<2x128xf32>
    %135 = arith.negf %134 : vector<2x128xf32>
    %136 = math.exp %135 : vector<2x128xf32>
    %cst_29 = arith.constant 1.000000e+00 : f32
    %137 = vector.broadcast %cst_29 : f32 to vector<2x128xf32>
    %138 = arith.addf %137, %136 : vector<2x128xf32>
    %139 = arith.divf %137, %138 : vector<2x128xf32>
    %cst_30 = arith.constant 2.000000e+00 : f32
    %140 = vector.broadcast %cst_30 : f32 to vector<2x128xf32>
    %141 = arith.mulf %140, %139 : vector<2x128xf32>
    %cst_31 = arith.constant 1.000000e+00 : f32
    %142 = vector.broadcast %cst_31 : f32 to vector<2x128xf32>
    %143 = arith.subf %141, %142 : vector<2x128xf32>
    %144 = arith.select %16, %143, %139 : vector<2x128xi1>, vector<2x128xf32>
    %145 = vector.extract_strided_slice %144 {offsets = [0, 32], sizes = [2, 32], strides = [1, 1]} : vector<2x128xf32> to vector<2x32xf32>
    %146 = arith.mulf %145, %105 : vector<2x32xf32>
    %147 = vector.extract_strided_slice %144 {offsets = [0, 0], sizes = [2, 32], strides = [1, 1]} : vector<2x128xf32> to vector<2x32xf32>
    %148 = vector.extract_strided_slice %144 {offsets = [0, 64], sizes = [2, 32], strides = [1, 1]} : vector<2x128xf32> to vector<2x32xf32>
    %149 = arith.mulf %147, %148 : vector<2x32xf32>
    %150 = arith.addf %146, %149 : vector<2x32xf32>
    %151 = vector.extract_strided_slice %144 {offsets = [0, 96], sizes = [2, 32], strides = [1, 1]} : vector<2x128xf32> to vector<2x32xf32>
    %152 = math.tanh %150 : vector<2x32xf32>
    %153 = arith.mulf %151, %152 : vector<2x32xf32>
    %154 = vector.extract_strided_slice %6 {offsets = [6, 0], sizes = [2, 128], strides = [1, 1]} : vector<16x128xf32> to vector<2x128xf32>
    %155 = arith.addf %154, %132 : vector<2x128xf32>
    %156 = arith.negf %155 : vector<2x128xf32>
    %157 = math.exp %156 : vector<2x128xf32>
    %cst_32 = arith.constant 1.000000e+00 : f32
    %158 = vector.broadcast %cst_32 : f32 to vector<2x128xf32>
    %159 = arith.addf %158, %157 : vector<2x128xf32>
    %160 = arith.divf %158, %159 : vector<2x128xf32>
    %cst_33 = arith.constant 2.000000e+00 : f32
    %161 = vector.broadcast %cst_33 : f32 to vector<2x128xf32>
    %162 = arith.mulf %161, %160 : vector<2x128xf32>
    %cst_34 = arith.constant 1.000000e+00 : f32
    %163 = vector.broadcast %cst_34 : f32 to vector<2x128xf32>
    %164 = arith.subf %162, %163 : vector<2x128xf32>
    %165 = arith.select %16, %164, %160 : vector<2x128xi1>, vector<2x128xf32>
    %166 = vector.extract_strided_slice %165 {offsets = [0, 32], sizes = [2, 32], strides = [1, 1]} : vector<2x128xf32> to vector<2x32xf32>
    %167 = arith.mulf %166, %126 : vector<2x32xf32>
    %168 = vector.extract_strided_slice %165 {offsets = [0, 0], sizes = [2, 32], strides = [1, 1]} : vector<2x128xf32> to vector<2x32xf32>
    %169 = vector.extract_strided_slice %165 {offsets = [0, 64], sizes = [2, 32], strides = [1, 1]} : vector<2x128xf32> to vector<2x32xf32>
    %170 = arith.mulf %168, %169 : vector<2x32xf32>
    %171 = arith.addf %167, %170 : vector<2x32xf32>
    %172 = vector.extract_strided_slice %165 {offsets = [0, 96], sizes = [2, 32], strides = [1, 1]} : vector<2x128xf32> to vector<2x32xf32>
    %173 = math.tanh %171 : vector<2x32xf32>
    %174 = arith.mulf %172, %173 : vector<2x32xf32>
    %175 = tpu.concatenate %174, %153 in 1 : vector<2x32xf32>, vector<2x32xf32> -> vector<2x64xf32>
    %cst_35 = arith.constant dense<0.000000e+00> : vector<2x256xf32>
    %176 = tpu.matmul %175, %7, %cst_35 {dimension_numbers = #tpu.dot_dimension_numbers<[1], [0], [0], [1], [0, 0, 1, 1], [], []>} : vector<2x64xf32>, vector<64x256xf32>, vector<2x256xf32> -> vector<2x256xf32>
    %177 = vector.extract_strided_slice %176 {offsets = [0, 128], sizes = [2, 128], strides = [1, 1]} : vector<2x256xf32> to vector<2x128xf32>
    %178 = vector.extract_strided_slice %176 {offsets = [0, 0], sizes = [2, 128], strides = [1, 1]} : vector<2x256xf32> to vector<2x128xf32>
    %179 = arith.addf %178, %10 : vector<2x128xf32>
    %180 = arith.negf %179 : vector<2x128xf32>
    %181 = math.exp %180 : vector<2x128xf32>
    %cst_36 = arith.constant 1.000000e+00 : f32
    %182 = vector.broadcast %cst_36 : f32 to vector<2x128xf32>
    %183 = arith.addf %182, %181 : vector<2x128xf32>
    %184 = arith.divf %182, %183 : vector<2x128xf32>
    %cst_37 = arith.constant 2.000000e+00 : f32
    %185 = vector.broadcast %cst_37 : f32 to vector<2x128xf32>
    %186 = arith.mulf %185, %184 : vector<2x128xf32>
    %cst_38 = arith.constant 1.000000e+00 : f32
    %187 = vector.broadcast %cst_38 : f32 to vector<2x128xf32>
    %188 = arith.subf %186, %187 : vector<2x128xf32>
    %189 = arith.select %16, %188, %184 : vector<2x128xi1>, vector<2x128xf32>
    %190 = vector.extract_strided_slice %189 {offsets = [0, 32], sizes = [2, 32], strides = [1, 1]} : vector<2x128xf32> to vector<2x32xf32>
    %191 = arith.mulf %190, %150 : vector<2x32xf32>
    %192 = vector.extract_strided_slice %189 {offsets = [0, 0], sizes = [2, 32], strides = [1, 1]} : vector<2x128xf32> to vector<2x32xf32>
    %193 = vector.extract_strided_slice %189 {offsets = [0, 64], sizes = [2, 32], strides = [1, 1]} : vector<2x128xf32> to vector<2x32xf32>
    %194 = arith.mulf %192, %193 : vector<2x32xf32>
    %195 = arith.addf %191, %194 : vector<2x32xf32>
    %196 = vector.extract_strided_slice %189 {offsets = [0, 96], sizes = [2, 32], strides = [1, 1]} : vector<2x128xf32> to vector<2x32xf32>
    %197 = math.tanh %195 : vector<2x32xf32>
    %198 = arith.mulf %196, %197 : vector<2x32xf32>
    %199 = vector.extract_strided_slice %6 {offsets = [8, 0], sizes = [2, 128], strides = [1, 1]} : vector<16x128xf32> to vector<2x128xf32>
    %200 = arith.addf %199, %177 : vector<2x128xf32>
    %201 = arith.negf %200 : vector<2x128xf32>
    %202 = math.exp %201 : vector<2x128xf32>
    %cst_39 = arith.constant 1.000000e+00 : f32
    %203 = vector.broadcast %cst_39 : f32 to vector<2x128xf32>
    %204 = arith.addf %203, %202 : vector<2x128xf32>
    %205 = arith.divf %203, %204 : vector<2x128xf32>
    %cst_40 = arith.constant 2.000000e+00 : f32
    %206 = vector.broadcast %cst_40 : f32 to vector<2x128xf32>
    %207 = arith.mulf %206, %205 : vector<2x128xf32>
    %cst_41 = arith.constant 1.000000e+00 : f32
    %208 = vector.broadcast %cst_41 : f32 to vector<2x128xf32>
    %209 = arith.subf %207, %208 : vector<2x128xf32>
    %210 = arith.select %16, %209, %205 : vector<2x128xi1>, vector<2x128xf32>
    %211 = vector.extract_strided_slice %210 {offsets = [0, 32], sizes = [2, 32], strides = [1, 1]} : vector<2x128xf32> to vector<2x32xf32>
    %212 = arith.mulf %211, %171 : vector<2x32xf32>
    %213 = vector.extract_strided_slice %210 {offsets = [0, 0], sizes = [2, 32], strides = [1, 1]} : vector<2x128xf32> to vector<2x32xf32>
    %214 = vector.extract_strided_slice %210 {offsets = [0, 64], sizes = [2, 32], strides = [1, 1]} : vector<2x128xf32> to vector<2x32xf32>
    %215 = arith.mulf %213, %214 : vector<2x32xf32>
    %216 = arith.addf %212, %215 : vector<2x32xf32>
    %217 = vector.extract_strided_slice %210 {offsets = [0, 96], sizes = [2, 32], strides = [1, 1]} : vector<2x128xf32> to vector<2x32xf32>
    %218 = math.tanh %216 : vector<2x32xf32>
    %219 = arith.mulf %217, %218 : vector<2x32xf32>
    %220 = tpu.concatenate %219, %198 in 1 : vector<2x32xf32>, vector<2x32xf32> -> vector<2x64xf32>
    %cst_42 = arith.constant dense<0.000000e+00> : vector<2x256xf32>
    %221 = tpu.matmul %220, %7, %cst_42 {dimension_numbers = #tpu.dot_dimension_numbers<[1], [0], [0], [1], [0, 0, 1, 1], [], []>} : vector<2x64xf32>, vector<64x256xf32>, vector<2x256xf32> -> vector<2x256xf32>
    %222 = vector.extract_strided_slice %221 {offsets = [0, 128], sizes = [2, 128], strides = [1, 1]} : vector<2x256xf32> to vector<2x128xf32>
    %223 = vector.extract_strided_slice %221 {offsets = [0, 0], sizes = [2, 128], strides = [1, 1]} : vector<2x256xf32> to vector<2x128xf32>
    %224 = arith.addf %223, %10 : vector<2x128xf32>
    %225 = arith.negf %224 : vector<2x128xf32>
    %226 = math.exp %225 : vector<2x128xf32>
    %cst_43 = arith.constant 1.000000e+00 : f32
    %227 = vector.broadcast %cst_43 : f32 to vector<2x128xf32>
    %228 = arith.addf %227, %226 : vector<2x128xf32>
    %229 = arith.divf %227, %228 : vector<2x128xf32>
    %cst_44 = arith.constant 2.000000e+00 : f32
    %230 = vector.broadcast %cst_44 : f32 to vector<2x128xf32>
    %231 = arith.mulf %230, %229 : vector<2x128xf32>
    %cst_45 = arith.constant 1.000000e+00 : f32
    %232 = vector.broadcast %cst_45 : f32 to vector<2x128xf32>
    %233 = arith.subf %231, %232 : vector<2x128xf32>
    %234 = arith.select %16, %233, %229 : vector<2x128xi1>, vector<2x128xf32>
    %235 = vector.extract_strided_slice %234 {offsets = [0, 32], sizes = [2, 32], strides = [1, 1]} : vector<2x128xf32> to vector<2x32xf32>
    %236 = arith.mulf %235, %195 : vector<2x32xf32>
    %237 = vector.extract_strided_slice %234 {offsets = [0, 0], sizes = [2, 32], strides = [1, 1]} : vector<2x128xf32> to vector<2x32xf32>
    %238 = vector.extract_strided_slice %234 {offsets = [0, 64], sizes = [2, 32], strides = [1, 1]} : vector<2x128xf32> to vector<2x32xf32>
    %239 = arith.mulf %237, %238 : vector<2x32xf32>
    %240 = arith.addf %236, %239 : vector<2x32xf32>
    %241 = vector.extract_strided_slice %234 {offsets = [0, 96], sizes = [2, 32], strides = [1, 1]} : vector<2x128xf32> to vector<2x32xf32>
    %242 = math.tanh %240 : vector<2x32xf32>
    %243 = arith.mulf %241, %242 : vector<2x32xf32>
    %244 = vector.extract_strided_slice %6 {offsets = [10, 0], sizes = [2, 128], strides = [1, 1]} : vector<16x128xf32> to vector<2x128xf32>
    %245 = arith.addf %244, %222 : vector<2x128xf32>
    %246 = arith.negf %245 : vector<2x128xf32>
    %247 = math.exp %246 : vector<2x128xf32>
    %cst_46 = arith.constant 1.000000e+00 : f32
    %248 = vector.broadcast %cst_46 : f32 to vector<2x128xf32>
    %249 = arith.addf %248, %247 : vector<2x128xf32>
    %250 = arith.divf %248, %249 : vector<2x128xf32>
    %cst_47 = arith.constant 2.000000e+00 : f32
    %251 = vector.broadcast %cst_47 : f32 to vector<2x128xf32>
    %252 = arith.mulf %251, %250 : vector<2x128xf32>
    %cst_48 = arith.constant 1.000000e+00 : f32
    %253 = vector.broadcast %cst_48 : f32 to vector<2x128xf32>
    %254 = arith.subf %252, %253 : vector<2x128xf32>
    %255 = arith.select %16, %254, %250 : vector<2x128xi1>, vector<2x128xf32>
    %256 = vector.extract_strided_slice %255 {offsets = [0, 32], sizes = [2, 32], strides = [1, 1]} : vector<2x128xf32> to vector<2x32xf32>
    %257 = arith.mulf %256, %216 : vector<2x32xf32>
    %258 = vector.extract_strided_slice %255 {offsets = [0, 0], sizes = [2, 32], strides = [1, 1]} : vector<2x128xf32> to vector<2x32xf32>
    %259 = vector.extract_strided_slice %255 {offsets = [0, 64], sizes = [2, 32], strides = [1, 1]} : vector<2x128xf32> to vector<2x32xf32>
    %260 = arith.mulf %258, %259 : vector<2x32xf32>
    %261 = arith.addf %257, %260 : vector<2x32xf32>
    %262 = vector.extract_strided_slice %255 {offsets = [0, 96], sizes = [2, 32], strides = [1, 1]} : vector<2x128xf32> to vector<2x32xf32>
    %263 = math.tanh %261 : vector<2x32xf32>
    %264 = arith.mulf %262, %263 : vector<2x32xf32>
    %265 = tpu.concatenate %264, %243 in 1 : vector<2x32xf32>, vector<2x32xf32> -> vector<2x64xf32>
    %cst_49 = arith.constant dense<0.000000e+00> : vector<2x256xf32>
    %266 = tpu.matmul %265, %7, %cst_49 {dimension_numbers = #tpu.dot_dimension_numbers<[1], [0], [0], [1], [0, 0, 1, 1], [], []>} : vector<2x64xf32>, vector<64x256xf32>, vector<2x256xf32> -> vector<2x256xf32>
    %267 = vector.extract_strided_slice %266 {offsets = [0, 128], sizes = [2, 128], strides = [1, 1]} : vector<2x256xf32> to vector<2x128xf32>
    %268 = vector.extract_strided_slice %266 {offsets = [0, 0], sizes = [2, 128], strides = [1, 1]} : vector<2x256xf32> to vector<2x128xf32>
    %269 = arith.addf %268, %10 : vector<2x128xf32>
    %270 = arith.negf %269 : vector<2x128xf32>
    %271 = math.exp %270 : vector<2x128xf32>
    %cst_50 = arith.constant 1.000000e+00 : f32
    %272 = vector.broadcast %cst_50 : f32 to vector<2x128xf32>
    %273 = arith.addf %272, %271 : vector<2x128xf32>
    %274 = arith.divf %272, %273 : vector<2x128xf32>
    %cst_51 = arith.constant 2.000000e+00 : f32
    %275 = vector.broadcast %cst_51 : f32 to vector<2x128xf32>
    %276 = arith.mulf %275, %274 : vector<2x128xf32>
    %cst_52 = arith.constant 1.000000e+00 : f32
    %277 = vector.broadcast %cst_52 : f32 to vector<2x128xf32>
    %278 = arith.subf %276, %277 : vector<2x128xf32>
    %279 = arith.select %16, %278, %274 : vector<2x128xi1>, vector<2x128xf32>
    %280 = vector.extract_strided_slice %279 {offsets = [0, 32], sizes = [2, 32], strides = [1, 1]} : vector<2x128xf32> to vector<2x32xf32>
    %281 = arith.mulf %280, %240 : vector<2x32xf32>
    %282 = vector.extract_strided_slice %279 {offsets = [0, 0], sizes = [2, 32], strides = [1, 1]} : vector<2x128xf32> to vector<2x32xf32>
    %283 = vector.extract_strided_slice %279 {offsets = [0, 64], sizes = [2, 32], strides = [1, 1]} : vector<2x128xf32> to vector<2x32xf32>
    %284 = arith.mulf %282, %283 : vector<2x32xf32>
    %285 = arith.addf %281, %284 : vector<2x32xf32>
    %286 = vector.extract_strided_slice %279 {offsets = [0, 96], sizes = [2, 32], strides = [1, 1]} : vector<2x128xf32> to vector<2x32xf32>
    %287 = math.tanh %285 : vector<2x32xf32>
    %288 = arith.mulf %286, %287 : vector<2x32xf32>
    %289 = vector.extract_strided_slice %6 {offsets = [12, 0], sizes = [2, 128], strides = [1, 1]} : vector<16x128xf32> to vector<2x128xf32>
    %290 = arith.addf %289, %267 : vector<2x128xf32>
    %291 = arith.negf %290 : vector<2x128xf32>
    %292 = math.exp %291 : vector<2x128xf32>
    %cst_53 = arith.constant 1.000000e+00 : f32
    %293 = vector.broadcast %cst_53 : f32 to vector<2x128xf32>
    %294 = arith.addf %293, %292 : vector<2x128xf32>
    %295 = arith.divf %293, %294 : vector<2x128xf32>
    %cst_54 = arith.constant 2.000000e+00 : f32
    %296 = vector.broadcast %cst_54 : f32 to vector<2x128xf32>
    %297 = arith.mulf %296, %295 : vector<2x128xf32>
    %cst_55 = arith.constant 1.000000e+00 : f32
    %298 = vector.broadcast %cst_55 : f32 to vector<2x128xf32>
    %299 = arith.subf %297, %298 : vector<2x128xf32>
    %300 = arith.select %16, %299, %295 : vector<2x128xi1>, vector<2x128xf32>
    %301 = vector.extract_strided_slice %300 {offsets = [0, 32], sizes = [2, 32], strides = [1, 1]} : vector<2x128xf32> to vector<2x32xf32>
    %302 = arith.mulf %301, %261 : vector<2x32xf32>
    %303 = vector.extract_strided_slice %300 {offsets = [0, 0], sizes = [2, 32], strides = [1, 1]} : vector<2x128xf32> to vector<2x32xf32>
    %304 = vector.extract_strided_slice %300 {offsets = [0, 64], sizes = [2, 32], strides = [1, 1]} : vector<2x128xf32> to vector<2x32xf32>
    %305 = arith.mulf %303, %304 : vector<2x32xf32>
    %306 = arith.addf %302, %305 : vector<2x32xf32>
    %307 = vector.extract_strided_slice %300 {offsets = [0, 96], sizes = [2, 32], strides = [1, 1]} : vector<2x128xf32> to vector<2x32xf32>
    %308 = math.tanh %306 : vector<2x32xf32>
    %309 = arith.mulf %307, %308 : vector<2x32xf32>
    %310 = tpu.concatenate %309, %288 in 1 : vector<2x32xf32>, vector<2x32xf32> -> vector<2x64xf32>
    %cst_56 = arith.constant dense<0.000000e+00> : vector<2x256xf32>
    %311 = tpu.matmul %310, %7, %cst_56 {dimension_numbers = #tpu.dot_dimension_numbers<[1], [0], [0], [1], [0, 0, 1, 1], [], []>} : vector<2x64xf32>, vector<64x256xf32>, vector<2x256xf32> -> vector<2x256xf32>
    %312 = vector.extract_strided_slice %311 {offsets = [0, 128], sizes = [2, 128], strides = [1, 1]} : vector<2x256xf32> to vector<2x128xf32>
    %313 = vector.extract_strided_slice %311 {offsets = [0, 0], sizes = [2, 128], strides = [1, 1]} : vector<2x256xf32> to vector<2x128xf32>
    %314 = arith.addf %313, %10 : vector<2x128xf32>
    %315 = arith.negf %314 : vector<2x128xf32>
    %316 = math.exp %315 : vector<2x128xf32>
    %cst_57 = arith.constant 1.000000e+00 : f32
    %317 = vector.broadcast %cst_57 : f32 to vector<2x128xf32>
    %318 = arith.addf %317, %316 : vector<2x128xf32>
    %319 = arith.divf %317, %318 : vector<2x128xf32>
    %cst_58 = arith.constant 2.000000e+00 : f32
    %320 = vector.broadcast %cst_58 : f32 to vector<2x128xf32>
    %321 = arith.mulf %320, %319 : vector<2x128xf32>
    %cst_59 = arith.constant 1.000000e+00 : f32
    %322 = vector.broadcast %cst_59 : f32 to vector<2x128xf32>
    %323 = arith.subf %321, %322 : vector<2x128xf32>
    %324 = arith.select %16, %323, %319 : vector<2x128xi1>, vector<2x128xf32>
    %325 = vector.extract_strided_slice %324 {offsets = [0, 32], sizes = [2, 32], strides = [1, 1]} : vector<2x128xf32> to vector<2x32xf32>
    %326 = arith.mulf %325, %285 : vector<2x32xf32>
    %327 = vector.extract_strided_slice %324 {offsets = [0, 0], sizes = [2, 32], strides = [1, 1]} : vector<2x128xf32> to vector<2x32xf32>
    %328 = vector.extract_strided_slice %324 {offsets = [0, 64], sizes = [2, 32], strides = [1, 1]} : vector<2x128xf32> to vector<2x32xf32>
    %329 = arith.mulf %327, %328 : vector<2x32xf32>
    %330 = arith.addf %326, %329 : vector<2x32xf32>
    %331 = vector.extract_strided_slice %324 {offsets = [0, 96], sizes = [2, 32], strides = [1, 1]} : vector<2x128xf32> to vector<2x32xf32>
    %332 = math.tanh %330 : vector<2x32xf32>
    %333 = arith.mulf %331, %332 : vector<2x32xf32>
    %334 = vector.extract_strided_slice %6 {offsets = [14, 0], sizes = [2, 128], strides = [1, 1]} : vector<16x128xf32> to vector<2x128xf32>
    %335 = arith.addf %334, %312 : vector<2x128xf32>
    %336 = arith.negf %335 : vector<2x128xf32>
    %337 = math.exp %336 : vector<2x128xf32>
    %cst_60 = arith.constant 1.000000e+00 : f32
    %338 = vector.broadcast %cst_60 : f32 to vector<2x128xf32>
    %339 = arith.addf %338, %337 : vector<2x128xf32>
    %340 = arith.divf %338, %339 : vector<2x128xf32>
    %cst_61 = arith.constant 2.000000e+00 : f32
    %341 = vector.broadcast %cst_61 : f32 to vector<2x128xf32>
    %342 = arith.mulf %341, %340 : vector<2x128xf32>
    %cst_62 = arith.constant 1.000000e+00 : f32
    %343 = vector.broadcast %cst_62 : f32 to vector<2x128xf32>
    %344 = arith.subf %342, %343 : vector<2x128xf32>
    %345 = arith.select %16, %344, %340 : vector<2x128xi1>, vector<2x128xf32>
    %346 = vector.extract_strided_slice %345 {offsets = [0, 32], sizes = [2, 32], strides = [1, 1]} : vector<2x128xf32> to vector<2x32xf32>
    %347 = arith.mulf %346, %306 : vector<2x32xf32>
    %348 = vector.extract_strided_slice %345 {offsets = [0, 0], sizes = [2, 32], strides = [1, 1]} : vector<2x128xf32> to vector<2x32xf32>
    %349 = vector.extract_strided_slice %345 {offsets = [0, 64], sizes = [2, 32], strides = [1, 1]} : vector<2x128xf32> to vector<2x32xf32>
    %350 = arith.mulf %348, %349 : vector<2x32xf32>
    %351 = arith.addf %347, %350 : vector<2x32xf32>
    %352 = vector.extract_strided_slice %345 {offsets = [0, 96], sizes = [2, 32], strides = [1, 1]} : vector<2x128xf32> to vector<2x32xf32>
    %353 = math.tanh %351 : vector<2x32xf32>
    %354 = arith.mulf %352, %353 : vector<2x32xf32>
    %355 = tpu.concatenate %354, %333 in 1 : vector<2x32xf32>, vector<2x32xf32> -> vector<2x64xf32>
    %cst_63 = arith.constant dense<0.000000e+00> : vector<2x256xf32>
    %356 = tpu.matmul %355, %7, %cst_63 {dimension_numbers = #tpu.dot_dimension_numbers<[1], [0], [0], [1], [0, 0, 1, 1], [], []>} : vector<2x64xf32>, vector<64x256xf32>, vector<2x256xf32> -> vector<2x256xf32>
    %357 = vector.extract_strided_slice %356 {offsets = [0, 0], sizes = [2, 128], strides = [1, 1]} : vector<2x256xf32> to vector<2x128xf32>
    %358 = arith.addf %357, %10 : vector<2x128xf32>
    %359 = arith.negf %358 : vector<2x128xf32>
    %360 = math.exp %359 : vector<2x128xf32>
    %cst_64 = arith.constant 1.000000e+00 : f32
    %361 = vector.broadcast %cst_64 : f32 to vector<2x128xf32>
    %362 = arith.addf %361, %360 : vector<2x128xf32>
    %363 = arith.divf %361, %362 : vector<2x128xf32>
    %cst_65 = arith.constant 2.000000e+00 : f32
    %364 = vector.broadcast %cst_65 : f32 to vector<2x128xf32>
    %365 = arith.mulf %364, %363 : vector<2x128xf32>
    %cst_66 = arith.constant 1.000000e+00 : f32
    %366 = vector.broadcast %cst_66 : f32 to vector<2x128xf32>
    %367 = arith.subf %365, %366 : vector<2x128xf32>
    %368 = arith.select %16, %367, %363 : vector<2x128xi1>, vector<2x128xf32>
    %369 = vector.extract_strided_slice %368 {offsets = [0, 32], sizes = [2, 32], strides = [1, 1]} : vector<2x128xf32> to vector<2x32xf32>
    %370 = arith.mulf %369, %330 : vector<2x32xf32>
    %371 = vector.extract_strided_slice %368 {offsets = [0, 0], sizes = [2, 32], strides = [1, 1]} : vector<2x128xf32> to vector<2x32xf32>
    %372 = vector.extract_strided_slice %368 {offsets = [0, 64], sizes = [2, 32], strides = [1, 1]} : vector<2x128xf32> to vector<2x32xf32>
    %373 = arith.mulf %371, %372 : vector<2x32xf32>
    %374 = arith.addf %370, %373 : vector<2x32xf32>
    %375 = vector.extract_strided_slice %368 {offsets = [0, 96], sizes = [2, 32], strides = [1, 1]} : vector<2x128xf32> to vector<2x32xf32>
    %376 = math.tanh %374 : vector<2x32xf32>
    %377 = arith.mulf %375, %376 : vector<2x32xf32>
    %378 = tpu.concatenate %63, %108, %153, %198, %243, %288, %333, %377 in 0 : vector<2x32xf32>, vector<2x32xf32>, vector<2x32xf32>, vector<2x32xf32>, vector<2x32xf32>, vector<2x32xf32>, vector<2x32xf32>, vector<2x32xf32> -> vector<16x32xf32>
    %c0_67 = arith.constant 0 : index
    %c0_68 = arith.constant 0 : index
    %379 = vector.load %arg5[%c0_67, %c0_68] : memref<32x8xf32, #tpu.memory_space<vmem>>, vector<32x8xf32>
    %cst_69 = arith.constant dense<0.000000e+00> : vector<16x8xf32>
    %380 = tpu.matmul %378, %379, %cst_69 {dimension_numbers = #tpu.dot_dimension_numbers<[1], [0], [0], [1], [0, 0, 1, 1], [], []>} : vector<16x32xf32>, vector<32x8xf32>, vector<16x8xf32> -> vector<16x8xf32>
    %c0_70 = arith.constant 0 : index
    %c0_71 = arith.constant 0 : index
    %381 = vector.load %arg6[%c0_70, %c0_71] : memref<1x8xf32, #tpu.memory_space<vmem>>, vector<1x8xf32>
    %382 = vector.shape_cast %381 : vector<1x8xf32> to vector<1x8xf32>
    %383 = vector.broadcast %382 : vector<1x8xf32> to vector<16x8xf32>
    %384 = arith.addf %380, %383 : vector<16x8xf32>
    %c0_72 = arith.constant 0 : index
    %c0_73 = arith.constant 0 : index
    %385 = vector.load %arg7[%c0_72, %c0_73] : memref<16x8xf32, #tpu.memory_space<vmem>>, vector<16x8xf32>
    tpu.vector_store %arg7[%c0_72, %c0_73], %384 {strides = array<i32>} : memref<16x8xf32, #tpu.memory_space<vmem>>, vector<16x8xf32>,
    return
  }
}

</mosaic_0001>

<bundles_post_ra>
// kernel: tpu_custom_call.1
= control target key start
LH: loop header
LB: loop body
LE: loop exit
PB: predicated region body
PF: predicated region fallthrough
CT: control target
= control target key end

     0   :  { %12 = vsyncpa [#allocation3], 0  ;;  %s1772_s24 = smov [#allocation2]   ;;  %s2150_s0 = inlined_call_operand.vmem [shape: f32[16,16], index: 0, kind: input, shape index: {}]   ;;  %s2151_s1 = inlined_call_operand.vmem [shape: f32[16,128], index: 1, kind: input, shape index: {}]   ;;  %s2152_s2 = inlined_call_operand.vmem [shape: f32[1,128], index: 2, kind: input, shape index: {}]   ;;  %s2153_s3 = inlined_call_operand.hbm [shape: f32[64,256], index: 3, kind: input, shape index: {}]   ;;  %s2154_s4 = inlined_call_operand.vmem [shape: f32[1,128], index: 4, kind: input, shape index: {}]   ;;  %s2155_s5 = inlined_call_operand.vmem [shape: f32[32,8], index: 5, kind: input, shape index: {}]   ;;  %s2156_s6 = inlined_call_operand.vmem [shape: f32[1,8], index: 6, kind: input, shape index: {}]   ;;  %s2157_s7 = inlined_call_operand.vmem [shape: f32[16,8], index: 7, kind: output, shape index: {}]  }
   0x1   :  { %s24_s25 = sshll.u32 %s1772_s24, 4  ;;  %s1748_s28 = scalar_lea.hbm %s2153_s3, 2048  ;;  %s25_s25 = int_to_ptr.vmem [resolvable:$true] %s24_s25 }
   0x2   :  { %p1749_p0 = scmp.ne.s32.totalorder %s2153_s3, %s1748_s28  ;;  %p1752_p1 = scmp.lt.u32.totalorder %s1748_s28, %s2153_s3 }
   0x4   :  { %p1754_p2 = pnand %p1752_p1, %p1749_p0 }
   0x6   :  { %1757 = shalt.err (!%p1754_p2)
}
   0x7   :  { %s1758_s10 = scalar_lea.vmem %s25_s25, 2048  ;;  %p1763_p4 = scmp.lt.s32.totalorder %s25_s25, %s25_s25 }
   0x8   :  { %p1759_p3 = scmp.ne.s32.totalorder %s25_s25, %s1758_s10  ;;  %p1764_p5 = scmp.lt.s32.totalorder %s1758_s10, %s1758_s10 }
   0xa   :  { %p1765_p6 = por %p1764_p5, %p1763_p4 }
   0xc   :  { %p1766_p7 = pnand %p1765_p6, %p1759_p3 }
   0xe   :  { %1769 = shalt.err (!%p1766_p7)
}
   0xf   :  { %s1773_s11 = smov 256   ;;  %s1774_s12 = smov 16  }
  0x10   :  { %30 = dma.hbm_to_vmem [thread:$0]  %s2153_s3, 2048, %s25_s25, [#allocation3], %s1773_s11, %s1773_s11, %s1774_s12  }
  0x11   :  { %1770 = dma.done.wait [#allocation3], 2048  }
  0x12   :  { %1771 = vsyncadd [#allocation3], 4294965248  ;;  %vm51_vm0 = vcmask 130048   ;;  %v42_v0 = vld [vmem:[%s2151_s1] sm:$0xff]  ;;  %v43_v1 = vld [vmem:[%s2151_s1 + $0x8] sm:$0xff]  ;;  %v156_v13 = vlaneseq  ;;  %s1776_s1 = smov 32  }
  0x13   :  { %v40_v2 = vld [vmem:[%s2150_s0] sm:$0xff]  ;;  %v1506_v3 = vpack.c.bf16 %v43_v1, %v42_v0  ;;  %v41_v4 = vld [vmem:[%s2150_s0 + $0x8] sm:$0xff]  ;;  %s1775_s0 = smov 64   ;;  %v136_v26 = vld [vmem:[#allocation2 + $0x18] sm:$0xff]  ;;  %v1777_v50 = vmov 0.0   ;;  %vm192_vm4 = vcmask 261120  }
  0x14   :  { %1492 = vmatprep.mubr.msk.f32.mxu0 %vm51_vm0, %v40_v2  ;;  %v1431_v5 = vld [vmem:[%s2152_s2] ss:$0 sm:$0xff]  ;;  %v157_v14 = vand.u32 127, %v156_v13  ;;  %v134_v25 = vld [vmem:[#allocation2 + $0x8] sm:$0xff]  ;;  %v135_v29 = vld [vmem:[#allocation2 + $0x10] sm:$0xff]  ;;  %262 = vmatprep.mubr.f32.mxu1 %v1777_v50  ;;  %vm194_vm5 = vcmask 523264  }
  0x15   :  { %1507 = vmatprep.subr.bf16.mxu0 %v1506_v3  ;;  %v133_v27 = vld [vmem:[#allocation2] sm:$0xff]  ;;  %v1861_v28 = vpack.c.bf16 %v136_v26, %v134_v25  ;;  %v138_v30 = vld [vmem:[#allocation2 + $0x28] sm:$0xff]  ;;  %v140_v31 = vld [vmem:[#allocation2 + $0x38] sm:$0xff]  ;;  %vm1318_vm6 = vcmask 1041408   ;;  %vm1320_vm7 = vcmask 1043456   ;;  %vm1322_vm8 = vcmask 1045504  }
  0x16   :  { %1509 = vmatpush3.bf16.msra.mxu0 %v1506_v3  ;;  %vm158_vm1 = vcmp.ge.s32.totalorder %v157_v14, 64  ;;  %vm159_vm2 = vcmp.lt.s32.totalorder %v157_v14, 96  ;;  %v1863_v32 = vpack.c.bf16 %v135_v29, %v133_v27  ;;  %v1865_v33 = vpack.c.bf16 %v140_v31, %v138_v30  ;;  %v137_v34 = vld [vmem:[#allocation2 + $0x20] sm:$0xff]  ;;  %v139_v35 = vld [vmem:[#allocation2 + $0x30] sm:$0xff]  ;;  %v142_v36 = vld [vmem:[#allocation2 + $0x48] sm:$0xff] }
  0x17   :  { %vm1850_vm3 = vmand %vm158_vm1, %vm159_vm2  ;;  %1511 = vmatprep.subr.bf16.mxu1 %v1861_v28  ;;  %v144_v37 = vld [vmem:[#allocation2 + $0x58] sm:$0xff]  ;;  %1527 = vmatprep.subr.bf16.mxu0 %v1861_v28  ;;  %v1870_v38 = vpack.c.bf16 %v139_v35, %v137_v34  ;;  %v141_v40 = vld [vmem:[#allocation2 + $0x40] sm:$0xff]  ;;  %vm1423_vm9 = vcmask 64512  }
  0x18   :  { %1513 = vmatpush1.bf16.msra.mxu1 %v1863_v32  ;;  %v1874_v39 = vpack.c.bf16 %v144_v37, %v142_v36  ;;  %v143_v41 = vld [vmem:[#allocation2 + $0x50] sm:$0xff]  ;;  %v146_v42 = vld [vmem:[#allocation2 + $0x68] sm:$0xff]  ;;  %v148_v43 = vld [vmem:[#allocation2 + $0x78] sm:$0xff] }
  0x19   :  { %1493 = vmatmul.mubr.msk.f32.vlgmr.msra.gmra.mrb[0].mxu0 %vm51_vm0, %v41_v4  ;;  %1515 = vmatprep.subr.bf16.mxu1 %v1865_v33  ;;  %v1878_v44 = vpack.c.bf16 %v143_v41, %v141_v40  ;;  %v1882_v45 = vpack.c.bf16 %v148_v43, %v146_v42  ;;  %v145_v46 = vld [vmem:[#allocation2 + $0x60] sm:$0xff]  ;;  %v147_v47 = vld [vmem:[#allocation2 + $0x70] sm:$0xff] }
  0x1a   :  { %1529 = vmatpush1.bf16.msra.mxu0 %v1863_v32  ;;  %v1887_v49 = vpack.c.bf16 %v147_v47, %v145_v46  ;;  %407 = vmatprep.mubr.f32.mxu0 %v1777_v50  ;;  %v1913_v55 = vld [vmem:[%s2154_s4] ss:$0 sm:$0xff] }
  0x1b   :  { %1531 = vmatprep.subr.bf16.mxu0 %v1865_v33  ;;  %v1327_v17 = vld [vmem:[%s2155_s5] sm:$0xff] }
  0x1c   :  { %1517 = vmatpush1.bf16.msra.mxu1 %v1870_v38 }
  0x1d   :  { %1519 = vmatprep.subr.bf16.mxu1 %v1874_v39 }
  0x1e   :  { %1533 = vmatpush1.bf16.msra.mxu0 %v1870_v38 }
  0x1f   :  { %1535 = vmatprep.subr.bf16.mxu0 %v1874_v39 }
  0x20   :  { %1521 = vmatpush1.bf16.msra.mxu1 %v1878_v44 }
  0x21   :  { %1523 = vmatprep.subr.bf16.mxu1 %v1882_v45 }
  0x22   :  { %1537 = vmatpush1.bf16.msra.mxu0 %v1878_v44 }
  0x23   :  { %1539 = vmatprep.subr.bf16.mxu0 %v1882_v45 }
  0x24   :  { %1525 = vmatpush1.bf16.msra.mxu1 %v1887_v49 }
  0x25   :  { %1543 = vmatprep.subr.bf16.mxu1 %v1861_v28 }
  0x26   :  { %1541 = vmatpush1.bf16.msra.mxu0 %v1887_v49 }
  0x27   :  { %1559 = vmatprep.subr.bf16.mxu0 %v1861_v28 }
  0xec   :  { %v1494_v6 = vpop.f32.mrb[0].mxu0 }
  0xed   :  { %v1845_v7 = vadd.f32 %v1494_v6, %v1431_v5  ;;  %v124_v8 = vpop.f32.mrb[1].mxu0 }
  0xee   :  { %v1847_v9 = vadd.f32 %v1431_v5, %v124_v8 }
  0xf0   :  { %v1435_v10 = vmul.f32 -1.442695, %v1847_v9 }
  0xf2   :  { %1652 = vpow2.f32 %v1435_v10 }
  0xfc   :  { %v1653_v11 = vpop.eup %1652 }
  0xfd   :  { %v165_v12 = vadd.f32 1.0, %v1653_v11 }
  0xff   :  { %1654 = vrcp.f32 %v165_v12 }
 0x109   :  { %v1655_v15 = vpop.eup %1654 }
 0x10a   :  { %v168_v16 = vmul.f32 2.0, %v1655_v15 }
 0x10c   :  { %v1436_v18 = vadd.f32 -1.0, %v168_v16 }
 0x10e   :  { %v170_v19 = vsel %vm1850_vm3, %v1436_v18, %v1655_v15 }
 0x10f   :  { %173 = vrot.lane.b32.xlu0 %v170_v19, %s1775_s0  ;;  %v171_v22 = vmul.f32 0.0, %v170_v19 }
 0x181   :  { %v174_v20 = vpop.permute.xlu0 %173 }
 0x182   :  { %v176_v21 = vmul.f32 %v174_v20, %v170_v19 }
 0x184   :  { %178 = vrot.lane.b32.xlu0 %v176_v21, %s1776_s1 }
 0x1f6   :  { %v179_v23 = vpop.permute.xlu0 %178 }
 0x1f7   :  { %v1858_v24 = vadd.f32 %v179_v23, %v171_v22 }
 0x1f9   :  { %1656 = vtanh.f32 %v1858_v24 }
 0x203   :  { %v1657_v48 = vpop.eup %1656 }
 0x204   :  { %184 = vrot.lane.b32.xlu1 %v1657_v48, %s1775_s0 }
 0x276   :  { %v185_v51 = vpop.permute.xlu1 %184 }
 0x277   :  { %v187_v52 = vmul.f32 %v185_v51, %v170_v19  ;;  %v310_v19 = vrot.slane %v1858_v24, 6 }
 0x279   :  { %189 = vrot.lane.b32.xlu1 %v187_v52, %s1776_s1 }
 0x2eb   :  { %v190_v53 = vpop.permute.xlu1 %189 }
 0x2ec   :  { %v193_v54 = vsel %vm192_vm4, %v190_v53, 0.0 }
 0x2ed   :  { %1437 = vmatmul.mubr.msk.f32.vlgmr.msra.gmra.mrb[0].mxu1 %vm194_vm5, %v193_v54 }
 0x2ee   :  { %1545 = vmatpush1.bf16.msra.mxu1 %v1863_v32  ;;  %552 = vmatprep.mubr.f32.mxu1 %v1777_v50 }
 0x2ef   :  { %1547 = vmatprep.subr.bf16.mxu1 %v1865_v33 }
 0x2f2   :  { %1549 = vmatpush1.bf16.msra.mxu1 %v1870_v38 }
 0x2f3   :  { %1551 = vmatprep.subr.bf16.mxu1 %v1874_v39 }
 0x2f6   :  { %1553 = vmatpush1.bf16.msra.mxu1 %v1878_v44 }
 0x2f7   :  { %1555 = vmatprep.subr.bf16.mxu1 %v1882_v45 }
 0x2fa   :  { %1557 = vmatpush1.bf16.msra.mxu1 %v1887_v49 }
 0x2fb   :  { %1575 = vmatprep.subr.bf16.mxu1 %v1861_v28 }
 0x3c0   :  { %v264_v56 = vpop.f32.mrb[0].mxu1 }
 0x3c1   :  { %v269_v57 = vadd.f32 %v1913_v55, %v264_v56  ;;  %v266_v58 = vpop.f32.mrb[1].mxu1 }
 0x3c2   :  { %v297_v59 = vrot.slane %v266_v58, 6 }
 0x3c3   :  { %v1438_v60 = vmul.f32 -1.442695, %v269_v57 }
 0x3c4   :  { %v299_v61 = vadd.f32 %v297_v59, %v1847_v9 }
 0x3c5   :  { %1658 = vpow2.f32 %v1438_v60 }
 0x3c6   :  { %v1440_v62 = vmul.f32 -1.442695, %v299_v61 }
 0x3c8   :  { %1660 = vpow2.f32 %v1440_v62 }
 0x3cf   :  { %v1659_v63 = vpop.eup %1658 }
 0x3d0   :  { %v273_v0 = vadd.f32 1.0, %v1659_v63 }
 0x3d2   :  { %v1661_v1 = vpop.eup %1660  ;;  %1662 = vrcp.f32 %v273_v0 }
 0x3d3   :  { %v303_v2 = vadd.f32 1.0, %v1661_v1 }
 0x3d5   :  { %1664 = vrcp.f32 %v303_v2 }
 0x3dc   :  { %v1663_v3 = vpop.eup %1662 }
 0x3dd   :  { %v276_v4 = vmul.f32 2.0, %v1663_v3 }
 0x3df   :  { %v1665_v5 = vpop.eup %1664  ;;  %v1439_v6 = vadd.f32 -1.0, %v276_v4 }
 0x3e0   :  { %v306_v8 = vmul.f32 2.0, %v1665_v5 }
 0x3e1   :  { %v278_v10 = vsel %vm1850_vm3, %v1439_v6, %v1663_v3 }
 0x3e2   :  { %281 = vrot.lane.b32.xlu0 %v278_v10, %s1775_s0  ;;  %v1441_v11 = vadd.f32 -1.0, %v306_v8  ;;  %v279_v18 = vmul.f32 0.0, %v278_v10 }
 0x3e4   :  { %v308_v12 = vsel %vm1850_vm3, %v1441_v11, %v1665_v5 }
 0x3e5   :  { %314 = vrot.lane.b32.xlu1 %v308_v12, %s1775_s0  ;;  %v312_v22 = vmul.f32 %v310_v19, %v308_v12 }
 0x454   :  { %v282_v13 = vpop.permute.xlu0 %281 }
 0x455   :  { %v284_v14 = vmul.f32 %v282_v13, %v278_v10 }
 0x457   :  { %286 = vrot.lane.b32.xlu0 %v284_v14, %s1776_s1  ;;  %v315_v15 = vpop.permute.xlu1 %314 }
 0x458   :  { %v317_v16 = vmul.f32 %v315_v15, %v308_v12 }
 0x45a   :  { %319 = vrot.lane.b32.xlu1 %v317_v16, %s1776_s1 }
 0x4c9   :  { %v287_v20 = vpop.permute.xlu0 %286 }
 0x4ca   :  { %v289_v21 = vadd.f32 %v287_v20, %v279_v18 }
 0x4cc   :  { %1666 = vtanh.f32 %v289_v21  ;;  %v320_v23 = vpop.permute.xlu1 %319 }
 0x4cd   :  { %v1926_v25 = vadd.f32 %v320_v23, %v312_v22 }
 0x4cf   :  { %1668 = vtanh.f32 %v1926_v25  ;;  %v455_v6 = vrot.slane %v1926_v25, 6 }
 0x4d6   :  { %v1667_v26 = vpop.eup %1666 }
 0x4d7   :  { %292 = vrot.lane.b32.xlu0 %v1667_v26, %s1775_s0 }
 0x4d9   :  { %v1669_v27 = vpop.eup %1668 }
 0x4da   :  { %325 = vrot.lane.b32.xlu1 %v1669_v27, %s1775_s0 }
 0x549   :  { %v293_v29 = vpop.permute.xlu0 %292 }
 0x54a   :  { %v1931_v30 = vmul.f32 %v293_v29, %v278_v10 }
 0x54c   :  { %v334_v24 = vrot.slane %v1931_v30, 6  ;;  %v326_v31 = vpop.permute.xlu1 %325 }
 0x54d   :  { %v328_v34 = vmul.f32 %v326_v31, %v308_v12 }
 0x54e   :  { %335 = vrot.lane.b32.xlu1 %v334_v24, %s1775_s0 }
 0x54f   :  { %330 = vrot.lane.b32.xlu0 %v328_v34, %s1776_s1 }
 0x5c0   :  { %v336_v35 = vpop.permute.xlu1 %335 }
 0x5c1   :  { %v331_v36 = vpop.permute.xlu0 %330 }
 0x5c2   :  { %v338_v37 = vsel %vm192_vm4, %v331_v36, %v336_v35 }
 0x5c3   :  { %v340_v40 = vrot.slane %v338_v37, 2 }
 0x5c5   :  { %1442 = vmatmul.mubr.msk.f32.vlgmr.msra.gmra.mrb[2].mxu0 %vm194_vm5, %v340_v40 }
 0x5c6   :  { %1561 = vmatpush1.bf16.msra.mxu0 %v1863_v32  ;;  %697 = vmatprep.mubr.f32.mxu0 %v1777_v50 }
 0x5c7   :  { %1563 = vmatprep.subr.bf16.mxu0 %v1865_v33 }
 0x5ca   :  { %1565 = vmatpush1.bf16.msra.mxu0 %v1870_v38 }
 0x5cb   :  { %1567 = vmatprep.subr.bf16.mxu0 %v1874_v39 }
 0x5ce   :  { %1569 = vmatpush1.bf16.msra.mxu0 %v1878_v44 }
 0x5cf   :  { %1571 = vmatprep.subr.bf16.mxu0 %v1882_v45 }
 0x5d2   :  { %1573 = vmatpush1.bf16.msra.mxu0 %v1887_v49 }
 0x5d3   :  { %1591 = vmatprep.subr.bf16.mxu0 %v1861_v28 }
 0x698   :  { %v409_v41 = vpop.f32.mrb[2].mxu0 }
 0x699   :  { %v414_v42 = vadd.f32 %v1913_v55, %v409_v41  ;;  %v411_v43 = vpop.f32.mrb[3].mxu0 }
 0x69a   :  { %v442_v46 = vrot.slane %v411_v43, 4 }
 0x69b   :  { %v1443_v47 = vmul.f32 -1.442695, %v414_v42 }
 0x69c   :  { %v444_v48 = vadd.f32 %v442_v46, %v1847_v9 }
 0x69d   :  { %1670 = vpow2.f32 %v1443_v47 }
 0x69e   :  { %v1445_v51 = vmul.f32 -1.442695, %v444_v48 }
 0x6a0   :  { %1672 = vpow2.f32 %v1445_v51 }
 0x6a7   :  { %v1671_v52 = vpop.eup %1670 }
 0x6a8   :  { %v418_v53 = vadd.f32 1.0, %v1671_v52 }
 0x6aa   :  { %v1673_v54 = vpop.eup %1672  ;;  %1674 = vrcp.f32 %v418_v53 }
 0x6ab   :  { %v448_v56 = vadd.f32 1.0, %v1673_v54 }
 0x6ad   :  { %1676 = vrcp.f32 %v448_v56 }
 0x6b4   :  { %v1675_v57 = vpop.eup %1674 }
 0x6b5   :  { %v421_v58 = vmul.f32 2.0, %v1675_v57 }
 0x6b7   :  { %v1677_v59 = vpop.eup %1676  ;;  %v1444_v60 = vadd.f32 -1.0, %v421_v58 }
 0x6b8   :  { %v451_v61 = vmul.f32 2.0, %v1677_v59 }
 0x6b9   :  { %v423_v62 = vsel %vm1850_vm3, %v1444_v60, %v1675_v57 }
 0x6ba   :  { %426 = vrot.lane.b32.xlu0 %v423_v62, %s1775_s0  ;;  %v1446_v63 = vadd.f32 -1.0, %v451_v61  ;;  %v424_v5 = vmul.f32 %v423_v62, %v289_v21 }
 0x6bc   :  { %v453_v0 = vsel %vm1850_vm3, %v1446_v63, %v1677_v59 }
 0x6bd   :  { %459 = vrot.lane.b32.xlu1 %v453_v0, %s1775_s0  ;;  %v457_v11 = vmul.f32 %v455_v6, %v453_v0 }
 0x72c   :  { %v427_v1 = vpop.permute.xlu0 %426 }
 0x72d   :  { %v429_v2 = vmul.f32 %v427_v1, %v423_v62 }
 0x72f   :  { %431 = vrot.lane.b32.xlu0 %v429_v2, %s1776_s1  ;;  %v460_v3 = vpop.permute.xlu1 %459 }
 0x730   :  { %v462_v4 = vmul.f32 %v460_v3, %v453_v0 }
 0x732   :  { %464 = vrot.lane.b32.xlu1 %v462_v4, %s1776_s1 }
 0x7a1   :  { %v432_v8 = vpop.permute.xlu0 %431 }
 0x7a2   :  { %v434_v10 = vadd.f32 %v432_v8, %v424_v5 }
 0x7a4   :  { %1678 = vtanh.f32 %v434_v10  ;;  %v465_v12 = vpop.permute.xlu1 %464 }
 0x7a5   :  { %v1958_v13 = vadd.f32 %v465_v12, %v457_v11 }
 0x7a7   :  { %1680 = vtanh.f32 %v1958_v13  ;;  %v600_v60 = vrot.slane %v1958_v13, 6 }
 0x7ae   :  { %v1679_v14 = vpop.eup %1678 }
 0x7af   :  { %437 = vrot.lane.b32.xlu0 %v1679_v14, %s1775_s0 }
 0x7b1   :  { %v1681_v15 = vpop.eup %1680 }
 0x7b2   :  { %470 = vrot.lane.b32.xlu1 %v1681_v15, %s1775_s0 }
 0x821   :  { %v438_v16 = vpop.permute.xlu0 %437 }
 0x822   :  { %v1963_v18 = vmul.f32 %v438_v16, %v423_v62 }
 0x824   :  { %v479_v19 = vrot.slane %v1963_v18, 4  ;;  %v471_v20 = vpop.permute.xlu1 %470  ;;  %v1305_v4 = vrot.slane %v1963_v18, 6 }
 0x825   :  { %v473_v21 = vmul.f32 %v471_v20, %v453_v0 }
 0x826   :  { %480 = vrot.lane.b32.xlu1 %v479_v19, %s1775_s0  ;;  %v1319_v13 = vsel %vm1318_vm6, %v1931_v30, %v1305_v4 }
 0x827   :  { %475 = vrot.lane.b32.xlu0 %v473_v21, %s1776_s1 }
 0x898   :  { %v481_v22 = vpop.permute.xlu1 %480 }
 0x899   :  { %v476_v23 = vpop.permute.xlu0 %475 }
 0x89a   :  { %v483_v25 = vsel %vm192_vm4, %v476_v23, %v481_v22 }
 0x89b   :  { %v485_v26 = vrot.slane %v483_v25, 4 }
 0x89d   :  { %1447 = vmatmul.mubr.msk.f32.vlgmr.msra.gmra.mrb[2].mxu1 %vm194_vm5, %v485_v26 }
 0x89e   :  { %1577 = vmatpush1.bf16.msra.mxu1 %v1863_v32  ;;  %837 = vmatprep.mubr.f32.mxu1 %v1777_v50 }
 0x89f   :  { %1579 = vmatprep.subr.bf16.mxu1 %v1865_v33 }
 0x8a2   :  { %1581 = vmatpush1.bf16.msra.mxu1 %v1870_v38 }
 0x8a3   :  { %1583 = vmatprep.subr.bf16.mxu1 %v1874_v39 }
 0x8a6   :  { %1585 = vmatpush1.bf16.msra.mxu1 %v1878_v44 }
 0x8a7   :  { %1587 = vmatprep.subr.bf16.mxu1 %v1882_v45 }
 0x8aa   :  { %1589 = vmatpush1.bf16.msra.mxu1 %v1887_v49 }
 0x8ab   :  { %1607 = vmatprep.subr.bf16.mxu1 %v1861_v28 }
 0x970   :  { %v554_v27 = vpop.f32.mrb[2].mxu1 }
 0x971   :  { %v559_v29 = vadd.f32 %v1913_v55, %v554_v27  ;;  %v556_v24 = vpop.f32.mrb[3].mxu1 }
 0x972   :  { %v587_v31 = vrot.slane %v556_v24, 2 }
 0x973   :  { %v1448_v34 = vmul.f32 -1.442695, %v559_v29 }
 0x974   :  { %v589_v35 = vadd.f32 %v587_v31, %v1847_v9 }
 0x975   :  { %1682 = vpow2.f32 %v1448_v34 }
 0x976   :  { %v1450_v36 = vmul.f32 -1.442695, %v589_v35 }
 0x978   :  { %1684 = vpow2.f32 %v1450_v36 }
 0x97f   :  { %v1683_v37 = vpop.eup %1682 }
 0x980   :  { %v563_v40 = vadd.f32 1.0, %v1683_v37 }
 0x982   :  { %v1685_v41 = vpop.eup %1684  ;;  %1686 = vrcp.f32 %v563_v40 }
 0x983   :  { %v593_v42 = vadd.f32 1.0, %v1685_v41 }
 0x985   :  { %1688 = vrcp.f32 %v593_v42 }
 0x98c   :  { %v1687_v43 = vpop.eup %1686 }
 0x98d   :  { %v566_v46 = vmul.f32 2.0, %v1687_v43 }
 0x98f   :  { %v1689_v47 = vpop.eup %1688  ;;  %v1449_v48 = vadd.f32 -1.0, %v566_v46 }
 0x990   :  { %v596_v51 = vmul.f32 2.0, %v1689_v47 }
 0x991   :  { %v568_v52 = vsel %vm1850_vm3, %v1449_v48, %v1687_v43 }
 0x992   :  { %571 = vrot.lane.b32.xlu0 %v568_v52, %s1775_s0  ;;  %v1451_v9 = vadd.f32 -1.0, %v596_v51  ;;  %v569_v59 = vmul.f32 %v568_v52, %v434_v10 }
 0x994   :  { %v598_v53 = vsel %vm1850_vm3, %v1451_v9, %v1689_v47 }
 0x995   :  { %604 = vrot.lane.b32.xlu1 %v598_v53, %s1775_s0  ;;  %v602_v63 = vmul.f32 %v600_v60, %v598_v53 }
 0xa04   :  { %v572_v54 = vpop.permute.xlu0 %571 }
 0xa05   :  { %v574_v56 = vmul.f32 %v572_v54, %v568_v52 }
 0xa07   :  { %576 = vrot.lane.b32.xlu0 %v574_v56, %s1776_s1  ;;  %v605_v57 = vpop.permute.xlu1 %604 }
 0xa08   :  { %v607_v58 = vmul.f32 %v605_v57, %v598_v53 }
 0xa0a   :  { %609 = vrot.lane.b32.xlu1 %v607_v58, %s1776_s1 }
 0xa79   :  { %v577_v61 = vpop.permute.xlu0 %576 }
 0xa7a   :  { %v1990_v62 = vadd.f32 %v577_v61, %v569_v59 }
 0xa7c   :  { %1690 = vtanh.f32 %v1990_v62  ;;  %v610_v0 = vpop.permute.xlu1 %609 }
 0xa7d   :  { %v1993_v1 = vadd.f32 %v610_v0, %v602_v63 }
 0xa7f   :  { %1692 = vtanh.f32 %v1993_v1  ;;  %v742_v48 = vrot.slane %v1993_v1, 6 }
 0xa86   :  { %v1691_v2 = vpop.eup %1690 }
 0xa87   :  { %582 = vrot.lane.b32.xlu0 %v1691_v2, %s1775_s0 }
 0xa89   :  { %v1693_v3 = vpop.eup %1692 }
 0xa8a   :  { %615 = vrot.lane.b32.xlu1 %v1693_v3, %s1775_s0 }
 0xaf9   :  { %v583_v5 = vpop.permute.xlu0 %582 }
 0xafa   :  { %v585_v6 = vmul.f32 %v583_v5, %v568_v52 }
 0xafc   :  { %v624_v8 = vrot.slane %v585_v6, 2  ;;  %v1307_v10 = vrot.slane %v585_v6, 4  ;;  %v616_v11 = vpop.permute.xlu1 %615 }
 0xafd   :  { %v618_v12 = vmul.f32 %v616_v11, %v598_v53 }
 0xafe   :  { %625 = vrot.lane.b32.xlu1 %v624_v8, %s1775_s0  ;;  %v2003_v14 = vsel %vm1320_vm7, %v1319_v13, %v1307_v10 }
 0xaff   :  { %620 = vrot.lane.b32.xlu0 %v618_v12, %s1776_s1 }
 0xb70   :  { %v626_v15 = vpop.permute.xlu1 %625 }
 0xb71   :  { %v621_v16 = vpop.permute.xlu0 %620 }
 0xb72   :  { %v628_v18 = vsel %vm192_vm4, %v621_v16, %v626_v15 }
 0xb73   :  { %v630_v19 = vrot.slane %v628_v18, 6 }
 0xb75   :  { %1452 = vmatmul.mubr.msk.f32.vlgmr.msra.gmra.mrb[4].mxu0 %vm194_vm5, %v630_v19 }
 0xb76   :  { %1593 = vmatpush1.bf16.msra.mxu0 %v1863_v32  ;;  %982 = vmatprep.mubr.f32.mxu0 %v1777_v50 }
 0xb77   :  { %1595 = vmatprep.subr.bf16.mxu0 %v1865_v33 }
 0xb7a   :  { %1597 = vmatpush1.bf16.msra.mxu0 %v1870_v38 }
 0xb7b   :  { %1599 = vmatprep.subr.bf16.mxu0 %v1874_v39 }
 0xb7e   :  { %1601 = vmatpush1.bf16.msra.mxu0 %v1878_v44 }
 0xb7f   :  { %1603 = vmatprep.subr.bf16.mxu0 %v1882_v45 }
 0xb82   :  { %1605 = vmatpush1.bf16.msra.mxu0 %v1887_v49 }
 0xb83   :  { %1623 = vmatprep.subr.bf16.mxu0 %v1861_v28 }
 0xc48   :  { %v699_v30 = vpop.f32.mrb[4].mxu0 }
 0xc49   :  { %v704_v20 = vadd.f32 %v1913_v55, %v699_v30  ;;  %v701_v21 = vpop.f32.mrb[5].mxu0 }
 0xc4a   :  { %v731_v22 = vadd.f32 %v701_v21, %v1845_v7 }
 0xc4b   :  { %v1453_v23 = vmul.f32 -1.442695, %v704_v20 }
 0xc4c   :  { %v1455_v25 = vmul.f32 -1.442695, %v731_v22 }
 0xc4d   :  { %1694 = vpow2.f32 %v1453_v23 }
 0xc4e   :  { %1696 = vpow2.f32 %v1455_v25 }
 0xc57   :  { %v1695_v26 = vpop.eup %1694 }
 0xc58   :  { %v1697_v27 = vpop.eup %1696  ;;  %v708_v29 = vadd.f32 1.0, %v1695_v26 }
 0xc59   :  { %v735_v24 = vadd.f32 1.0, %v1697_v27 }
 0xc5a   :  { %1698 = vrcp.f32 %v708_v29 }
 0xc5b   :  { %1700 = vrcp.f32 %v735_v24 }
 0xc64   :  { %v1699_v31 = vpop.eup %1698 }
 0xc65   :  { %v1701_v34 = vpop.eup %1700  ;;  %v711_v35 = vmul.f32 2.0, %v1699_v31 }
 0xc66   :  { %v738_v28 = vmul.f32 2.0, %v1701_v34 }
 0xc67   :  { %v1454_v36 = vadd.f32 -1.0, %v711_v35 }
 0xc68   :  { %v1456_v37 = vadd.f32 -1.0, %v738_v28 }
 0xc69   :  { %v713_v40 = vsel %vm1850_vm3, %v1454_v36, %v1699_v31 }
 0xc6a   :  { %716 = vrot.lane.b32.xlu0 %v713_v40, %s1775_s0  ;;  %v740_v41 = vsel %vm1850_vm3, %v1456_v37, %v1701_v34  ;;  %v714_v51 = vmul.f32 %v713_v40, %v1990_v62 }
 0xc6b   :  { %746 = vrot.lane.b32.xlu1 %v740_v41, %s1775_s0  ;;  %v744_v9 = vmul.f32 %v742_v48, %v740_v41 }
 0xcdc   :  { %v717_v42 = vpop.permute.xlu0 %716 }
 0xcdd   :  { %v719_v43 = vmul.f32 %v717_v42, %v713_v40  ;;  %v747_v46 = vpop.permute.xlu1 %746 }
 0xcde   :  { %v749_v47 = vmul.f32 %v747_v46, %v740_v41 }
 0xcdf   :  { %721 = vrot.lane.b32.xlu0 %v719_v43, %s1776_s1 }
 0xce0   :  { %751 = vrot.lane.b32.xlu1 %v749_v47, %s1776_s1 }
 0xd51   :  { %v722_v52 = vpop.permute.xlu0 %721 }
 0xd52   :  { %v724_v53 = vadd.f32 %v722_v52, %v714_v51  ;;  %v752_v54 = vpop.permute.xlu1 %751 }
 0xd53   :  { %v2029_v56 = vadd.f32 %v752_v54, %v744_v9 }
 0xd54   :  { %1702 = vtanh.f32 %v724_v53 }
 0xd55   :  { %1704 = vtanh.f32 %v2029_v56  ;;  %v885_v34 = vrot.slane %v2029_v56, 6 }
 0xd5e   :  { %v1703_v57 = vpop.eup %1702 }
 0xd5f   :  { %v1705_v58 = vpop.eup %1704  ;;  %727 = vrot.lane.b32.xlu0 %v1703_v57, %s1775_s0 }
 0xd60   :  { %757 = vrot.lane.b32.xlu1 %v1705_v58, %s1775_s0 }
 0xdd1   :  { %v728_v59 = vpop.permute.xlu0 %727 }
 0xdd2   :  { %v730_v60 = vmul.f32 %v728_v59, %v713_v40  ;;  %v758_v61 = vpop.permute.xlu1 %757 }
 0xdd3   :  { %v760_v63 = vmul.f32 %v758_v61, %v740_v41 }
 0xdd4   :  { %v1309_v62 = vrot.slane %v730_v60, 2  ;;  %766 = vrot.lane.b32.xlu1 %v730_v60, %s1775_s0 }
 0xdd5   :  { %762 = vrot.lane.b32.xlu0 %v760_v63, %s1776_s1 }
 0xdd6   :  { %v2038_v0 = vsel %vm1322_vm8, %v2003_v14, %v1309_v62 }
 0xe46   :  { %v767_v1 = vpop.permute.xlu1 %766 }
 0xe47   :  { %v763_v2 = vpop.permute.xlu0 %762 }
 0xe48   :  { %v769_v3 = vsel %vm192_vm4, %v763_v2, %v767_v1 }
 0xe49   :  { %1457 = vmatmul.mubr.msk.f32.vlgmr.msra.gmra.mrb[4].mxu1 %vm194_vm5, %v769_v3 }
 0xe4a   :  { %1609 = vmatpush1.bf16.msra.mxu1 %v1863_v32  ;;  %1127 = vmatprep.mubr.f32.mxu1 %v1777_v50 }
 0xe4b   :  { %1611 = vmatprep.subr.bf16.mxu1 %v1865_v33 }
 0xe4e   :  { %1613 = vmatpush1.bf16.msra.mxu1 %v1870_v38 }
 0xe4f   :  { %1615 = vmatprep.subr.bf16.mxu1 %v1874_v39 }
 0xe52   :  { %1617 = vmatpush1.bf16.msra.mxu1 %v1878_v44 }
 0xe53   :  { %1619 = vmatprep.subr.bf16.mxu1 %v1882_v45 }
 0xe56   :  { %1621 = vmatpush1.bf16.msra.mxu1 %v1887_v49 }
 0xf1c   :  { %v839_v4 = vpop.f32.mrb[4].mxu1 }
 0xf1d   :  { %v844_v5 = vadd.f32 %v1913_v55, %v839_v4  ;;  %v841_v6 = vpop.f32.mrb[5].mxu1 }
 0xf1e   :  { %v872_v8 = vrot.slane %v841_v6, 6 }
 0xf1f   :  { %v1458_v10 = vmul.f32 -1.442695, %v844_v5 }
 0xf20   :  { %v874_v11 = vadd.f32 %v872_v8, %v1845_v7 }
 0xf21   :  { %1706 = vpow2.f32 %v1458_v10 }
 0xf22   :  { %v1460_v12 = vmul.f32 -1.442695, %v874_v11 }
 0xf24   :  { %1708 = vpow2.f32 %v1460_v12 }
 0xf2b   :  { %v1707_v13 = vpop.eup %1706 }
 0xf2c   :  { %v848_v14 = vadd.f32 1.0, %v1707_v13 }
 0xf2e   :  { %v1709_v15 = vpop.eup %1708  ;;  %1710 = vrcp.f32 %v848_v14 }
 0xf2f   :  { %v878_v16 = vadd.f32 1.0, %v1709_v15 }
 0xf31   :  { %1712 = vrcp.f32 %v878_v16 }
 0xf38   :  { %v1711_v18 = vpop.eup %1710 }
 0xf39   :  { %v851_v19 = vmul.f32 2.0, %v1711_v18 }
 0xf3b   :  { %v1713_v30 = vpop.eup %1712  ;;  %v1459_v20 = vadd.f32 -1.0, %v851_v19 }
 0xf3c   :  { %v881_v21 = vmul.f32 2.0, %v1713_v30 }
 0xf3d   :  { %v853_v22 = vsel %vm1850_vm3, %v1459_v20, %v1711_v18 }
 0xf3e   :  { %856 = vrot.lane.b32.xlu0 %v853_v22, %s1775_s0  ;;  %v1461_v23 = vadd.f32 -1.0, %v881_v21  ;;  %v854_v31 = vmul.f32 %v853_v22, %v724_v53 }
 0xf40   :  { %v883_v25 = vsel %vm1850_vm3, %v1461_v23, %v1713_v30 }
 0xf41   :  { %889 = vrot.lane.b32.xlu1 %v883_v25, %s1775_s0  ;;  %v887_v36 = vmul.f32 %v885_v34, %v883_v25 }
 0xfb0   :  { %v857_v26 = vpop.permute.xlu0 %856 }
 0xfb1   :  { %v859_v27 = vmul.f32 %v857_v26, %v853_v22 }
 0xfb3   :  { %861 = vrot.lane.b32.xlu0 %v859_v27, %s1776_s1  ;;  %v890_v29 = vpop.permute.xlu1 %889 }
 0xfb4   :  { %v892_v24 = vmul.f32 %v890_v29, %v883_v25 }
 0xfb6   :  { %894 = vrot.lane.b32.xlu1 %v892_v24, %s1776_s1 }
0x1025   :  { %v862_v35 = vpop.permute.xlu0 %861 }
0x1026   :  { %v864_v28 = vadd.f32 %v862_v35, %v854_v31 }
0x1028   :  { %1714 = vtanh.f32 %v864_v28  ;;  %v895_v37 = vpop.permute.xlu1 %894 }
0x1029   :  { %v897_v40 = vadd.f32 %v895_v37, %v887_v36 }
0x102b   :  { %1716 = vtanh.f32 %v897_v40  ;;  %v1030_v11 = vrot.slane %v897_v40, 6 }
0x1032   :  { %v1715_v41 = vpop.eup %1714 }
0x1033   :  { %867 = vrot.lane.b32.xlu0 %v1715_v41, %s1775_s0 }
0x1035   :  { %v1717_v42 = vpop.eup %1716 }
0x1036   :  { %900 = vrot.lane.b32.xlu1 %v1717_v42, %s1775_s0 }
0x10a5   :  { %v868_v43 = vpop.permute.xlu0 %867 }
0x10a6   :  { %v2063_v46 = vmul.f32 %v868_v43, %v853_v22 }
0x10a8   :  { %v909_v47 = vrot.slane %v2063_v46, 6  ;;  %v901_v48 = vpop.permute.xlu1 %900 }
0x10a9   :  { %v903_v51 = vmul.f32 %v901_v48, %v883_v25 }
0x10aa   :  { %910 = vrot.lane.b32.xlu1 %v909_v47, %s1775_s0 }
0x10ab   :  { %905 = vrot.lane.b32.xlu0 %v903_v51, %s1776_s1 }
0x111c   :  { %v911_v52 = vpop.permute.xlu1 %910 }
0x111d   :  { %v906_v9 = vpop.permute.xlu0 %905 }
0x111e   :  { %v913_v53 = vsel %vm192_vm4, %v906_v9, %v911_v52 }
0x111f   :  { %v915_v54 = vrot.slane %v913_v53, 2 }
0x1121   :  { %1462 = vmatmul.mubr.msk.f32.vlgmr.msra.gmra.mrb[6].mxu0 %vm194_vm5, %v915_v54 }
0x1122   :  { %1625 = vmatpush1.bf16.msra.mxu0 %v1863_v32  ;;  %1272 = vmatprep.mubr.f32.mxu0 %v1777_v50 }
0x1123   :  { %1627 = vmatprep.subr.bf16.mxu0 %v1865_v33 }
0x1126   :  { %1629 = vmatpush1.bf16.msra.mxu0 %v1870_v38 }
0x1127   :  { %1631 = vmatprep.subr.bf16.mxu0 %v1874_v39 }
0x112a   :  { %1633 = vmatpush1.bf16.msra.mxu0 %v1878_v44 }
0x112b   :  { %1635 = vmatprep.subr.bf16.mxu0 %v1882_v45 }
0x112e   :  { %1637 = vmatpush1.bf16.msra.mxu0 %v1887_v49 }
0x11f4   :  { %v984_v56 = vpop.f32.mrb[6].mxu0 }
0x11f5   :  { %v989_v57 = vadd.f32 %v1913_v55, %v984_v56  ;;  %v986_v58 = vpop.f32.mrb[7].mxu0 }
0x11f6   :  { %v1017_v59 = vrot.slane %v986_v58, 4 }
0x11f7   :  { %v1463_v32 = vmul.f32 -1.442695, %v989_v57 }
0x11f8   :  { %v1019_v50 = vadd.f32 %v1017_v59, %v1845_v7 }
0x11f9   :  { %1718 = vpow2.f32 %v1463_v32 }
0x11fa   :  { %v1465_v33 = vmul.f32 -1.442695, %v1019_v50 }
0x11fc   :  { %1720 = vpow2.f32 %v1465_v33 }
0x1203   :  { %v1719_v38 = vpop.eup %1718 }
0x1204   :  { %v993_v60 = vadd.f32 1.0, %v1719_v38 }
0x1206   :  { %v1721_v39 = vpop.eup %1720  ;;  %1722 = vrcp.f32 %v993_v60 }
0x1207   :  { %v1023_v44 = vadd.f32 1.0, %v1721_v39 }
0x1209   :  { %1724 = vrcp.f32 %v1023_v44 }
0x1210   :  { %v1723_v45 = vpop.eup %1722 }
0x1211   :  { %v996_v61 = vmul.f32 2.0, %v1723_v45 }
0x1213   :  { %v1725_v49 = vpop.eup %1724  ;;  %v1464_v63 = vadd.f32 -1.0, %v996_v61 }
0x1214   :  { %v1026_v62 = vmul.f32 2.0, %v1725_v49 }
0x1215   :  { %v998_v1 = vsel %vm1850_vm3, %v1464_v63, %v1723_v45 }
0x1216   :  { %1001 = vrot.lane.b32.xlu0 %v998_v1, %s1775_s0  ;;  %v1466_v2 = vadd.f32 -1.0, %v1026_v62  ;;  %v999_v10 = vmul.f32 %v998_v1, %v864_v28 }
0x1218   :  { %v1028_v3 = vsel %vm1850_vm3, %v1466_v2, %v1725_v49 }
0x1219   :  { %1034 = vrot.lane.b32.xlu1 %v1028_v3, %s1775_s0  ;;  %v1032_v14 = vmul.f32 %v1030_v11, %v1028_v3 }
0x1288   :  { %v1002_v4 = vpop.permute.xlu0 %1001 }
0x1289   :  { %v1004_v5 = vmul.f32 %v1002_v4, %v998_v1 }
0x128b   :  { %1006 = vrot.lane.b32.xlu0 %v1004_v5, %s1776_s1  ;;  %v1035_v6 = vpop.permute.xlu1 %1034 }
0x128c   :  { %v1037_v8 = vmul.f32 %v1035_v6, %v1028_v3 }
0x128e   :  { %1039 = vrot.lane.b32.xlu1 %v1037_v8, %s1776_s1 }
0x12fd   :  { %v1007_v12 = vpop.permute.xlu0 %1006 }
0x12fe   :  { %v1009_v13 = vadd.f32 %v1007_v12, %v999_v10 }
0x1300   :  { %1726 = vtanh.f32 %v1009_v13  ;;  %v1040_v15 = vpop.permute.xlu1 %1039 }
0x1301   :  { %v1042_v16 = vadd.f32 %v1040_v15, %v1032_v14 }
0x1303   :  { %1728 = vtanh.f32 %v1042_v16  ;;  %v1175_v50 = vrot.slane %v1042_v16, 6 }
0x130a   :  { %v1727_v18 = vpop.eup %1726 }
0x130b   :  { %1012 = vrot.lane.b32.xlu0 %v1727_v18, %s1775_s0 }
0x130d   :  { %v1729_v19 = vpop.eup %1728 }
0x130e   :  { %1045 = vrot.lane.b32.xlu1 %v1729_v19, %s1775_s0 }
0x137d   :  { %v1013_v30 = vpop.permute.xlu0 %1012 }
0x137e   :  { %v2090_v20 = vmul.f32 %v1013_v30, %v998_v1 }
0x1380   :  { %v1054_v21 = vrot.slane %v2090_v20, 4  ;;  %v1046_v22 = vpop.permute.xlu1 %1045  ;;  %v1311_v49 = vrot.slane %v2090_v20, 6 }
0x1381   :  { %v1048_v23 = vmul.f32 %v1046_v22, %v1028_v3 }
0x1382   :  { %1055 = vrot.lane.b32.xlu1 %v1054_v21, %s1775_s0  ;;  %v1324_v5 = vsel %vm1318_vm6, %v2063_v46, %v1311_v49 }
0x1383   :  { %1050 = vrot.lane.b32.xlu0 %v1048_v23, %s1776_s1 }
0x13f4   :  { %v1056_v25 = vpop.permute.xlu1 %1055 }
0x13f5   :  { %v1051_v26 = vpop.permute.xlu0 %1050 }
0x13f6   :  { %v1058_v27 = vsel %vm192_vm4, %v1051_v26, %v1056_v25 }
0x13f7   :  { %v1060_v29 = vrot.slane %v1058_v27, 4 }
0x13f9   :  { %1467 = vmatmul.mubr.msk.f32.vlgmr.msra.gmra.mrb[6].mxu1 %vm194_vm5, %v1060_v29  ;;  %v1328_v29 = vld [vmem:[%s2155_s5 + $0x8] sm:$0xff] }
0x14cc   :  { %v1129_v24 = vpop.f32.mrb[6].mxu1 }
0x14cd   :  { %v1134_v31 = vadd.f32 %v1913_v55, %v1129_v24  ;;  %v1131_v34 = vpop.f32.mrb[7].mxu1  ;;  %v1329_v24 = vld [vmem:[%s2155_s5 + $0x10] sm:$0xff] }
0x14ce   :  { %v1162_v35 = vrot.slane %v1131_v34, 2 }
0x14cf   :  { %v1468_v28 = vmul.f32 -1.442695, %v1134_v31  ;;  %v1330_v31 = vld [vmem:[%s2155_s5 + $0x18] sm:$0xff] }
0x14d0   :  { %v1164_v36 = vadd.f32 %v1162_v35, %v1845_v7  ;;  %v1642_v34 = vpack.c.bf16 %v1330_v31, %v1329_v24 }
0x14d1   :  { %1730 = vpow2.f32 %v1468_v28 }
0x14d2   :  { %v1470_v37 = vmul.f32 -1.442695, %v1164_v36 }
0x14d4   :  { %1732 = vpow2.f32 %v1470_v37 }
0x14db   :  { %v1731_v40 = vpop.eup %1730 }
0x14dc   :  { %v1138_v41 = vadd.f32 1.0, %v1731_v40 }
0x14de   :  { %v1733_v42 = vpop.eup %1732  ;;  %1734 = vrcp.f32 %v1138_v41 }
0x14df   :  { %v1168_v43 = vadd.f32 1.0, %v1733_v42  ;;  %v1475_v42 = vld [vmem:[%s2156_s6] ss:$0 sm:$0xff] }
0x14e1   :  { %1736 = vrcp.f32 %v1168_v43 }
0x14e8   :  { %v1735_v47 = vpop.eup %1734 }
0x14e9   :  { %v1141_v48 = vmul.f32 2.0, %v1735_v47 }
0x14eb   :  { %v1737_v51 = vpop.eup %1736  ;;  %v1469_v52 = vadd.f32 -1.0, %v1141_v48 }
0x14ec   :  { %v1171_v9 = vmul.f32 2.0, %v1737_v51 }
0x14ed   :  { %v1143_v53 = vsel %vm1850_vm3, %v1469_v52, %v1735_v47 }
0x14ee   :  { %1146 = vrot.lane.b32.xlu0 %v1143_v53, %s1775_s0  ;;  %v1471_v7 = vadd.f32 -1.0, %v1171_v9  ;;  %v1144_v32 = vmul.f32 %v1143_v53, %v1009_v13 }
0x14f0   :  { %v1173_v54 = vsel %vm1850_vm3, %v1471_v7, %v1737_v51 }
0x14f1   :  { %1179 = vrot.lane.b32.xlu1 %v1173_v54, %s1775_s0  ;;  %v1177_v60 = vmul.f32 %v1175_v50, %v1173_v54 }
0x1560   :  { %v1147_v56 = vpop.permute.xlu0 %1146 }
0x1561   :  { %v1149_v57 = vmul.f32 %v1147_v56, %v1143_v53 }
0x1563   :  { %1151 = vrot.lane.b32.xlu0 %v1149_v57, %s1776_s1  ;;  %v1180_v58 = vpop.permute.xlu1 %1179 }
0x1564   :  { %v1182_v59 = vmul.f32 %v1180_v58, %v1173_v54 }
0x1566   :  { %1184 = vrot.lane.b32.xlu1 %v1182_v59, %s1776_s1 }
0x15d5   :  { %v1152_v33 = vpop.permute.xlu0 %1151 }
0x15d6   :  { %v1154_v38 = vadd.f32 %v1152_v33, %v1144_v32 }
0x15d8   :  { %1738 = vtanh.f32 %v1154_v38  ;;  %v1185_v39 = vpop.permute.xlu1 %1184 }
0x15d9   :  { %v1187_v44 = vadd.f32 %v1185_v39, %v1177_v60 }
0x15db   :  { %1740 = vtanh.f32 %v1187_v44 }
0x15e2   :  { %v1739_v45 = vpop.eup %1738 }
0x15e3   :  { %1157 = vrot.lane.b32.xlu0 %v1739_v45, %s1775_s0 }
0x15e5   :  { %v1741_v61 = vpop.eup %1740 }
0x15e6   :  { %1190 = vrot.lane.b32.xlu1 %v1741_v61, %s1775_s0 }
0x1655   :  { %v1158_v63 = vpop.permute.xlu0 %1157 }
0x1656   :  { %v1160_v62 = vmul.f32 %v1158_v63, %v1143_v53 }
0x1658   :  { %v1199_v1 = vrot.slane %v1160_v62, 2  ;;  %v1313_v2 = vrot.slane %v1160_v62, 4  ;;  %v1191_v3 = vpop.permute.xlu1 %1190 }
0x1659   :  { %v1193_v4 = vmul.f32 %v1191_v3, %v1173_v54 }
0x165a   :  { %1200 = vrot.lane.b32.xlu1 %v1199_v1, %s1775_s0  ;;  %v1325_v6 = vsel %vm1320_vm7, %v1324_v5, %v1313_v2 }
0x165b   :  { %1195 = vrot.lane.b32.xlu0 %v1193_v4, %s1776_s1 }
0x16cc   :  { %v1201_v8 = vpop.permute.xlu1 %1200 }
0x16cd   :  { %v1196_v10 = vpop.permute.xlu0 %1195 }
0x16ce   :  { %v1203_v11 = vsel %vm192_vm4, %v1196_v10, %v1201_v8 }
0x16cf   :  { %v1205_v12 = vrot.slane %v1203_v11, 6 }
0x16d1   :  { %1472 = vmatmul.mubr.msk.f32.vlgmr.msra.gmra.mrb[8].mxu0 %vm194_vm5, %v1205_v12 }
0x17a4   :  { %v1274_v13 = vpop.f32.mrb[8].mxu0 }
0x17a5   :  { %v1278_v14 = vadd.f32 %v1913_v55, %v1274_v13  ;;  %v1276_v15 = vpop.f32.mrb[9].mxu0 }
0x17a7   :  { %v1473_v16 = vmul.f32 -1.442695, %v1278_v14 }
0x17a9   :  { %1742 = vpow2.f32 %v1473_v16 }
0x17b3   :  { %v1743_v46 = vpop.eup %1742 }
0x17b4   :  { %v1282_v18 = vadd.f32 1.0, %v1743_v46 }
0x17b6   :  { %1744 = vrcp.f32 %v1282_v18 }
0x17c0   :  { %v1745_v19 = vpop.eup %1744 }
0x17c1   :  { %v1285_v30 = vmul.f32 2.0, %v1745_v19 }
0x17c3   :  { %v1474_v20 = vadd.f32 -1.0, %v1285_v30 }
0x17c5   :  { %v1287_v21 = vsel %vm1850_vm3, %v1474_v20, %v1745_v19 }
0x17c6   :  { %1290 = vrot.lane.b32.xlu0 %v1287_v21, %s1775_s0  ;;  %v1288_v55 = vmul.f32 %v1287_v21, %v1154_v38 }
0x1838   :  { %v1291_v22 = vpop.permute.xlu0 %1290 }
0x1839   :  { %v1293_v23 = vmul.f32 %v1291_v22, %v1287_v21 }
0x183b   :  { %1295 = vrot.lane.b32.xlu1 %v1293_v23, %s1776_s1 }
0x183f   :  { %1340 = vrot.lane.b32.xlu1 %v2038_v0, %s1776_s1  ;;  %v1638_v0 = vpack.c.bf16 %v1328_v29, %v1327_v17 }
0x1841   :  { %1639 = vmatprep.subr.bf16.mxu1 %v1638_v0 }
0x1842   :  { %1641 = vmatpush3.bf16.msra.mxu1 %v1638_v0 }
0x1843   :  { %1643 = vmatprep.subr.bf16.mxu1 %v1642_v34 }
0x1846   :  { %1645 = vmatpush3.bf16.msra.mxu1 %v1642_v34 }
0x18ad   :  { %v1296_v25 = vpop.permute.xlu1 %1295 }
0x18ae   :  { %v1298_v26 = vadd.f32 %v1296_v25, %v1288_v55 }
0x18b0   :  { %1746 = vtanh.f32 %v1298_v26 }
0x18b1   :  { %v1341_v27 = vpop.permute.xlu1 %1340 }
0x18b2   :  { %1503 = vmatprep.mubr.msk.f32.mxu1 %vm192_vm4, %v1341_v27 }
0x18ba   :  { %v1747_v35 = vpop.eup %1746 }
0x18bb   :  { %1301 = vrot.lane.b32.xlu0 %v1747_v35, %s1775_s0 }
0x192d   :  { %v1302_v28 = vpop.permute.xlu0 %1301 }
0x192e   :  { %v1304_v36 = vmul.f32 %v1302_v28, %v1287_v21 }
0x1930   :  { %v1316_v37 = vrot.slane %v1304_v36, 2 }
0x1932   :  { %v1326_v40 = vsel %vm1322_vm8, %v1325_v6, %v1316_v37 }
0x1933   :  { %1342 = vrot.lane.b32.xlu0 %v1326_v40, %s1776_s1 }
0x19a5   :  { %v1343_v41 = vpop.permute.xlu0 %1342 }
0x19a6   :  { %1504 = vmatmul.mubr.msk.f32.vlgmr.msra.gmra.mrb[8].mxu1 %vm192_vm4, %v1343_v41 }
0x1a79   :  { %v1505_v43 = vpop.f32.mrb[8].mxu1 }
0x1a7a   :  { %v1420_v47 = vadd.f32 %v1505_v43, %v1475_v42  ;;  %v1414_v48 = vpop.f32.mrb[9].mxu1 }
0x1a7b   :  { %v1415_v51 = vadd.f32 %v1475_v42, %v1414_v48 }
0x1a7c   :  { %1425 = vst.msk [vmem:[%s2157_s7 + $0x8] sm:$0xff] %vm1423_vm9, %v1420_v47 }
0x1a7d   :  { %1424 = vst.msk [vmem:[%s2157_s7] sm:$0xff] %vm1423_vm9, %v1415_v51 }
0x1a7e   :  { %1430 = vsyncpa [#allocation3], 1 }

</bundles_post_ra>
